<compile_context>
chip_gen: v5e
topology: v5e:2x2
jax: 0.10.0
libtpu: 0.0.40
codegen_flags: <defaults>
</compile_context>

<pallas_src>
import functools

import jax
import jax.numpy as jnp
from jax import lax
from jax.experimental import pallas as pl
from jax.experimental.pallas import tpu as pltpu


def _self_attention_kernel(x_ref, wq_ref, bq_ref, wk_ref, bk_ref,
                           wv_ref, bv_ref, wo_ref, bo_ref, o_ref, ctx_ref,
                           *, heads, head_dim):
    """One grid step = one batch element.

    x_ref        : (1, N, D)   bf16  (cast in wrapper)
    wq/wk/wv_ref : (H, D, Hd)  bf16  (head-major; 1/sqrt(Hd) folded into wq)
    bq/bk/bv_ref : (H, 1, Hd)  f32
    wo_ref       : (H*Hd, D)   bf16  (head-major rows)
    bo_ref       : (1, D)      f32
    o_ref        : (1, N, D)   f32
    ctx_ref      : (N, H*Hd)   bf16  VMEM scratch (per-head context slabs)
    """
    x = x_ref[0]                                                    # (N, D) bf16

    # Per-head Q/K/V projections: full K = D contraction, weights indexed along
    # the free leading dim -> no lane-narrow slices of lane-dense activations.
    for h in range(heads):
        q = jnp.dot(x, wq_ref[h], preferred_element_type=jnp.float32) + bq_ref[h]
        k = jnp.dot(x, wk_ref[h], preferred_element_type=jnp.float32) + bk_ref[h]
        v = jnp.dot(x, wv_ref[h], preferred_element_type=jnp.float32) + bv_ref[h]

        # q @ k^T without materializing a transpose: contract the last dims.
        s = lax.dot_general(q.astype(jnp.bfloat16), k.astype(jnp.bfloat16),
                            (((1,), (1,)), ((), ())),
                            preferred_element_type=jnp.float32)     # (N, N) f32

        # Numerically-stable softmax; normalization goes to the EUP reciprocal.
        s = s - jnp.max(s, axis=-1, keepdims=True)
        p = jnp.exp(s)
        p = p * pl.reciprocal(jnp.sum(p, axis=-1, keepdims=True), approx=True)

        ctx = jnp.dot(p.astype(jnp.bfloat16), v.astype(jnp.bfloat16),
                      preferred_element_type=jnp.float32)           # (N, Hd) f32

        # Park this head's context at its static lane offset; only the scratch
        # ref stays live across head iterations.
        lo = h * head_dim
        ctx_ref[:, lo:lo + head_dim] = ctx.astype(jnp.bfloat16)

    # Single fused output projection: contraction depth H*Hd = D (not Hd), and
    # one lane-dense (N, D) accumulator write instead of H read-modify-writes.
    out = jnp.dot(ctx_ref[...], wo_ref[...],
                  preferred_element_type=jnp.float32) + bo_ref[0]
    o_ref[0] = out.astype(o_ref.dtype)


def _vmem_limit_bytes():
    """Per-generation VMEM budget (v5e/v6e: 128 MiB, v7x: 64 MiB per TC)."""
    cap = 64 * 1024 * 1024
    try:
        info = pltpu.get_tpu_info()
        cap = getattr(info, "vmem_capacity_bytes", cap) or cap
    except Exception:
        pass
    return int(min(cap * 3 // 4, 96 * 1024 * 1024))


def self_attention(x, params, heads):
    """x: (B, N, D) float32.  params: dict of flattened f32 weights/biases."""
    B, N, D = x.shape
    head_dim = D // heads
    inv_scale = float(head_dim) ** -0.5

    # Head-major per-head weight slabs (H, D, Hd); scale folded into Wq / bq at
    # the same XLA op that casts the weights to bf16 (no in-kernel multiply).
    wq = (params["wq"].reshape(D, heads, head_dim) * inv_scale
          ).transpose(1, 0, 2).astype(jnp.bfloat16)                 # (H, D, Hd)
    wk = params["wk"].reshape(D, heads, head_dim).transpose(1, 0, 2).astype(jnp.bfloat16)
    wv = params["wv"].reshape(D, heads, head_dim).transpose(1, 0, 2).astype(jnp.bfloat16)
    wo = params["wo"].astype(jnp.bfloat16)                          # (H*Hd, D)
    bq = params["bq"].reshape(heads, 1, head_dim) * inv_scale       # (H, 1, Hd)
    bk = params["bk"].reshape(heads, 1, head_dim)
    bv = params["bv"].reshape(heads, 1, head_dim)
    bo = params["bo"]                                               # (1, D)

    # bf16 x halves its double-buffered DMA footprint; output stays f32.
    xb = x.astype(jnp.bfloat16)

    kernel = functools.partial(_self_attention_kernel,
                               heads=heads, head_dim=head_dim)

    def const_spec(a):
        # Constant across grid steps -> single-buffer (double-buffering would
        # reserve 2x VMEM for operands that are never re-fetched).
        nd = a.ndim
        return pl.BlockSpec(a.shape, lambda b, _nd=nd: (0,) * _nd,
                            pipeline_mode=pl.Buffered(1))

    return pl.pallas_call(
        kernel,
        out_shape=jax.ShapeDtypeStruct((B, N, D), x.dtype),
        grid=(B,),
        in_specs=[
            pl.BlockSpec((1, N, D), lambda b: (b, 0, 0)),            # x
            const_spec(wq), const_spec(bq),
            const_spec(wk), const_spec(bk),
            const_spec(wv), const_spec(bv),
            const_spec(wo), const_spec(bo),
        ],
        out_specs=pl.BlockSpec((1, N, D), lambda b: (b, 0, 0)),
        scratch_shapes=[pltpu.VMEM((N, heads * head_dim), jnp.bfloat16)],
        compiler_params=pltpu.CompilerParams(
            dimension_semantics=("parallel",),
            vmem_limit_bytes=_vmem_limit_bytes()),
    )(xb, wq, bq, wk, bk, wv, bv, wo, bo)


def make_params(key, in_dim, heads):
    """Deterministic synthetic weights mirroring LinearGeneral's shapes.

    Weights are scaled by 1/sqrt(in_dim) (and small nonzero biases used) so all
    activations stay O(1); this only conditions the bf16 numerical comparison —
    the kernel itself is scale-agnostic.
    """
    head_dim = in_dim // heads
    kq, kk, kv, ko, kb = jax.random.split(key, 5)
    w_scale = in_dim ** -0.5
    # torch.randn(*in_dim, *feat_dim) -> (D, H, Hd), flattened head-major (D, H*Hd)
    wq = (jax.random.normal(kq, (in_dim, heads, head_dim), jnp.float32)
          * w_scale).reshape(in_dim, heads * head_dim)
    wk = (jax.random.normal(kk, (in_dim, heads, head_dim), jnp.float32)
          * w_scale).reshape(in_dim, heads * head_dim)
    wv = (jax.random.normal(kv, (in_dim, heads, head_dim), jnp.float32)
          * w_scale).reshape(in_dim, heads * head_dim)
    # out: (H, Hd, D) flattened to (H*Hd, D)
    wo = (jax.random.normal(ko, (heads, head_dim, in_dim), jnp.float32)
          * w_scale).reshape(heads * head_dim, in_dim)
    b1, b2, b3, b4 = jax.random.split(kb, 4)
    bq = 0.1 * jax.random.normal(b1, (1, heads * head_dim), jnp.float32)
    bk = 0.1 * jax.random.normal(b2, (1, heads * head_dim), jnp.float32)
    bv = 0.1 * jax.random.normal(b3, (1, heads * head_dim), jnp.float32)
    bo = 0.1 * jax.random.normal(b4, (1, in_dim), jnp.float32)
    return dict(wq=wq, bq=bq, wk=wk, bk=bk, wv=wv, bv=bv, wo=wo, bo=bo)


def self_attention_ref(x, params, heads):
    """Pure-JAX f32 reference matching the PyTorch forward."""
    B, N, D = x.shape
    head_dim = D // heads
    scale = float(head_dim) ** 0.5

    def proj(w, b):
        y = jnp.einsum("bnd,de->bne", x, w) + b[0]
        return y.reshape(B, N, heads, head_dim).transpose(0, 2, 1, 3)

    q = proj(params["wq"], params["bq"])
    k = proj(params["wk"], params["bk"])
    v = proj(params["wv"], params["bv"])
    s = jnp.einsum("bhnd,bhmd->bhnm", q, k) / scale
    p = jax.nn.softmax(s, axis=-1)
    o = jnp.einsum("bhnm,bhmd->bhnd", p, v).transpose(0, 2, 1, 3).reshape(
        B, N, heads * head_dim)
    return jnp.einsum("bne,ed->bnd", o, params["wo"]) + params["bo"][0]


if __name__ == "__main__":
    # Small but lane-dense config: batch=2, seq=16, embed=128, heads=8 (head_dim=16).
    B, N, D, H = 2, 16, 128, 8

    key = jax.random.PRNGKey(0)
    kx, kp = jax.random.split(key)
    x = jax.random.normal(kx, (B, N, D), jnp.float32)
    params = make_params(kp, D, H)

    out = jax.block_until_ready(self_attention(x, params, H))
    ref = self_attention_ref(x, params, H)

    assert out.shape == (B, N, D)
    # bf16 MXU inputs with f32 accumulation: compare at bf16-level tolerance.
    err = float(jnp.max(jnp.abs(out - ref)) / jnp.max(jnp.abs(ref)))
    assert err < 5e-2, f"mismatch vs reference: rel-max err {err}"

    print("KERNEL_OK")
</pallas_src>

<mosaic_0001>
module attributes {stable_mosaic.version = 11 : i64} {
  func.func @_self_attention_kernel(%arg0: i32, %arg1: memref<1x16x128xbf16, #tpu.memory_space<vmem>>, %arg2: memref<8x128x16xbf16, #tpu.memory_space<vmem>>, %arg3: memref<8x1x16xf32, #tpu.memory_space<vmem>>, %arg4: memref<8x128x16xbf16, #tpu.memory_space<vmem>>, %arg5: memref<8x1x16xf32, #tpu.memory_space<vmem>>, %arg6: memref<8x128x16xbf16, #tpu.memory_space<vmem>>, %arg7: memref<8x1x16xf32, #tpu.memory_space<vmem>>, %arg8: memref<128x128xbf16, #tpu.memory_space<vmem>>, %arg9: memref<1x128xf32, #tpu.memory_space<vmem>>, %arg10: memref<1x16x128xf32, #tpu.memory_space<vmem>>, %arg11: memref<16x128xbf16, #tpu.memory_space<vmem>>) attributes {dimension_semantics = [#tpu.dimension_semantics<parallel>], iteration_bounds = array<i64: 2>, scalar_prefetch = 0 : i64, scratch_operands = 1 : i64, tpu.core_type = #tpu.core_type<tc>, window_params = [{transform_indices = @transform_0, window_bounds = array<i64: 1, 16, 128>}, {pipeline_mode = #tpu.pipeline_mode<synchronous>, transform_indices = @transform_1, window_bounds = array<i64: 8, 128, 16>}, {pipeline_mode = #tpu.pipeline_mode<synchronous>, transform_indices = @transform_2, window_bounds = array<i64: 8, 1, 16>}, {pipeline_mode = #tpu.pipeline_mode<synchronous>, transform_indices = @transform_3, window_bounds = array<i64: 8, 128, 16>}, {pipeline_mode = #tpu.pipeline_mode<synchronous>, transform_indices = @transform_4, window_bounds = array<i64: 8, 1, 16>}, {pipeline_mode = #tpu.pipeline_mode<synchronous>, transform_indices = @transform_5, window_bounds = array<i64: 8, 128, 16>}, {pipeline_mode = #tpu.pipeline_mode<synchronous>, transform_indices = @transform_6, window_bounds = array<i64: 8, 1, 16>}, {pipeline_mode = #tpu.pipeline_mode<synchronous>, transform_indices = @transform_7, window_bounds = array<i64: 128, 128>}, {pipeline_mode = #tpu.pipeline_mode<synchronous>, transform_indices = @transform_8, window_bounds = array<i64: 1, 128>}, {transform_indices = @transform_9, window_bounds = array<i64: 1, 16, 128>}]} {
    %c0 = arith.constant 0 : index
    %c0_0 = arith.constant 0 : index
    %c0_1 = arith.constant 0 : index
    %0 = vector.load %arg1[%c0, %c0_0, %c0_1] : memref<1x16x128xbf16, #tpu.memory_space<vmem>>, vector<1x16x128xbf16>
    %1 = vector.shape_cast %0 : vector<1x16x128xbf16> to vector<16x128xbf16>
    %c0_2 = arith.constant 0 : index
    %c0_3 = arith.constant 0 : index
    %c0_4 = arith.constant 0 : index
    %2 = vector.load %arg2[%c0_2, %c0_3, %c0_4] : memref<8x128x16xbf16, #tpu.memory_space<vmem>>, vector<1x128x16xbf16>
    %3 = vector.shape_cast %2 : vector<1x128x16xbf16> to vector<128x16xbf16>
    %cst = arith.constant dense<0.000000e+00> : vector<16x16xf32>
    %4 = tpu.matmul %1, %3, %cst {dimension_numbers = #tpu.dot_dimension_numbers<[1], [0], [0], [1], [0, 0, 1, 1], [], []>} : vector<16x128xbf16>, vector<128x16xbf16>, vector<16x16xf32> -> vector<16x16xf32>
    %c0_5 = arith.constant 0 : index
    %c0_6 = arith.constant 0 : index
    %c0_7 = arith.constant 0 : index
    %5 = vector.load %arg3[%c0_5, %c0_6, %c0_7] : memref<8x1x16xf32, #tpu.memory_space<vmem>>, vector<1x1x16xf32>
    %6 = vector.shape_cast %5 : vector<1x1x16xf32> to vector<1x16xf32>
    %7 = vector.broadcast %6 : vector<1x16xf32> to vector<16x16xf32>
    %8 = arith.addf %4, %7 : vector<16x16xf32>
    %c0_8 = arith.constant 0 : index
    %c0_9 = arith.constant 0 : index
    %c0_10 = arith.constant 0 : index
    %9 = vector.load %arg4[%c0_8, %c0_9, %c0_10] : memref<8x128x16xbf16, #tpu.memory_space<vmem>>, vector<1x128x16xbf16>
    %10 = vector.shape_cast %9 : vector<1x128x16xbf16> to vector<128x16xbf16>
    %cst_11 = arith.constant dense<0.000000e+00> : vector<16x16xf32>
    %11 = tpu.matmul %1, %10, %cst_11 {dimension_numbers = #tpu.dot_dimension_numbers<[1], [0], [0], [1], [0, 0, 1, 1], [], []>} : vector<16x128xbf16>, vector<128x16xbf16>, vector<16x16xf32> -> vector<16x16xf32>
    %c0_12 = arith.constant 0 : index
    %c0_13 = arith.constant 0 : index
    %c0_14 = arith.constant 0 : index
    %12 = vector.load %arg5[%c0_12, %c0_13, %c0_14] : memref<8x1x16xf32, #tpu.memory_space<vmem>>, vector<1x1x16xf32>
    %13 = vector.shape_cast %12 : vector<1x1x16xf32> to vector<1x16xf32>
    %14 = vector.broadcast %13 : vector<1x16xf32> to vector<16x16xf32>
    %15 = arith.addf %11, %14 : vector<16x16xf32>
    %c0_15 = arith.constant 0 : index
    %c0_16 = arith.constant 0 : index
    %c0_17 = arith.constant 0 : index
    %16 = vector.load %arg6[%c0_15, %c0_16, %c0_17] : memref<8x128x16xbf16, #tpu.memory_space<vmem>>, vector<1x128x16xbf16>
    %17 = vector.shape_cast %16 : vector<1x128x16xbf16> to vector<128x16xbf16>
    %cst_18 = arith.constant dense<0.000000e+00> : vector<16x16xf32>
    %18 = tpu.matmul %1, %17, %cst_18 {dimension_numbers = #tpu.dot_dimension_numbers<[1], [0], [0], [1], [0, 0, 1, 1], [], []>} : vector<16x128xbf16>, vector<128x16xbf16>, vector<16x16xf32> -> vector<16x16xf32>
    %c0_19 = arith.constant 0 : index
    %c0_20 = arith.constant 0 : index
    %c0_21 = arith.constant 0 : index
    %19 = vector.load %arg7[%c0_19, %c0_20, %c0_21] : memref<8x1x16xf32, #tpu.memory_space<vmem>>, vector<1x1x16xf32>
    %20 = vector.shape_cast %19 : vector<1x1x16xf32> to vector<1x16xf32>
    %21 = vector.broadcast %20 : vector<1x16xf32> to vector<16x16xf32>
    %22 = arith.addf %18, %21 : vector<16x16xf32>
    %23 = arith.truncf %8 : vector<16x16xf32> to vector<16x16xbf16>
    %24 = arith.truncf %15 : vector<16x16xf32> to vector<16x16xbf16>
    %cst_22 = arith.constant dense<0.000000e+00> : vector<16x16xf32>
    %25 = tpu.matmul %23, %24, %cst_22 {dimension_numbers = #tpu.dot_dimension_numbers<[1], [1], [0], [0], [0, 0, 1, 0], [], []>} : vector<16x16xbf16>, vector<16x16xbf16>, vector<16x16xf32> -> vector<16x16xf32>
    %cst_23 = arith.constant dense<0xFF800000> : vector<16xf32>
    %26 = vector.multi_reduction <maximumf>, %25, %cst_23 [1] : vector<16x16xf32> to vector<16xf32>
    %27 = vector.shape_cast %26 : vector<16xf32> to vector<16x1xf32>
    %28 = vector.broadcast %27 : vector<16x1xf32> to vector<16x16xf32>
    %29 = arith.subf %25, %28 : vector<16x16xf32>
    %30 = math.exp %29 : vector<16x16xf32>
    %cst_24 = arith.constant dense<0.000000e+00> : vector<16xf32>
    %31 = vector.multi_reduction <add>, %30, %cst_24 [1] : vector<16x16xf32> to vector<16xf32>
    %32 = vector.shape_cast %31 : vector<16xf32> to vector<16x1xf32>
    %33 = tpu.reciprocal %32 {approx = true} : vector<16x1xf32> -> vector<16x1xf32>
    %34 = vector.broadcast %33 : vector<16x1xf32> to vector<16x16xf32>
    %35 = arith.mulf %30, %34 : vector<16x16xf32>
    %36 = arith.truncf %35 : vector<16x16xf32> to vector<16x16xbf16>
    %37 = arith.truncf %22 : vector<16x16xf32> to vector<16x16xbf16>
    %cst_25 = arith.constant dense<0.000000e+00> : vector<16x16xf32>
    %38 = tpu.matmul %36, %37, %cst_25 {dimension_numbers = #tpu.dot_dimension_numbers<[1], [0], [0], [1], [0, 0, 1, 1], [], []>} : vector<16x16xbf16>, vector<16x16xbf16>, vector<16x16xf32> -> vector<16x16xf32>
    %39 = arith.truncf %38 : vector<16x16xf32> to vector<16x16xbf16>
    %c0_26 = arith.constant 0 : index
    %c0_27 = arith.constant 0 : index
    %40 = vector.load %arg11[%c0_26, %c0_27] : memref<16x128xbf16, #tpu.memory_space<vmem>>, vector<16x16xbf16>
    tpu.vector_store %arg11[%c0_26, %c0_27], %39 {strides = array<i32>} : memref<16x128xbf16, #tpu.memory_space<vmem>>, vector<16x16xbf16>,
    %c1 = arith.constant 1 : index
    %c0_28 = arith.constant 0 : index
    %c0_29 = arith.constant 0 : index
    %41 = vector.load %arg2[%c1, %c0_28, %c0_29] : memref<8x128x16xbf16, #tpu.memory_space<vmem>>, vector<1x128x16xbf16>
    %42 = vector.shape_cast %41 : vector<1x128x16xbf16> to vector<128x16xbf16>
    %cst_30 = arith.constant dense<0.000000e+00> : vector<16x16xf32>
    %43 = tpu.matmul %1, %42, %cst_30 {dimension_numbers = #tpu.dot_dimension_numbers<[1], [0], [0], [1], [0, 0, 1, 1], [], []>} : vector<16x128xbf16>, vector<128x16xbf16>, vector<16x16xf32> -> vector<16x16xf32>
    %c1_31 = arith.constant 1 : index
    %c0_32 = arith.constant 0 : index
    %c0_33 = arith.constant 0 : index
    %44 = vector.load %arg3[%c1_31, %c0_32, %c0_33] : memref<8x1x16xf32, #tpu.memory_space<vmem>>, vector<1x1x16xf32>
    %45 = vector.shape_cast %44 : vector<1x1x16xf32> to vector<1x16xf32>
    %46 = vector.broadcast %45 : vector<1x16xf32> to vector<16x16xf32>
    %47 = arith.addf %43, %46 : vector<16x16xf32>
    %c1_34 = arith.constant 1 : index
    %c0_35 = arith.constant 0 : index
    %c0_36 = arith.constant 0 : index
    %48 = vector.load %arg4[%c1_34, %c0_35, %c0_36] : memref<8x128x16xbf16, #tpu.memory_space<vmem>>, vector<1x128x16xbf16>
    %49 = vector.shape_cast %48 : vector<1x128x16xbf16> to vector<128x16xbf16>
    %cst_37 = arith.constant dense<0.000000e+00> : vector<16x16xf32>
    %50 = tpu.matmul %1, %49, %cst_37 {dimension_numbers = #tpu.dot_dimension_numbers<[1], [0], [0], [1], [0, 0, 1, 1], [], []>} : vector<16x128xbf16>, vector<128x16xbf16>, vector<16x16xf32> -> vector<16x16xf32>
    %c1_38 = arith.constant 1 : index
    %c0_39 = arith.constant 0 : index
    %c0_40 = arith.constant 0 : index
    %51 = vector.load %arg5[%c1_38, %c0_39, %c0_40] : memref<8x1x16xf32, #tpu.memory_space<vmem>>, vector<1x1x16xf32>
    %52 = vector.shape_cast %51 : vector<1x1x16xf32> to vector<1x16xf32>
    %53 = vector.broadcast %52 : vector<1x16xf32> to vector<16x16xf32>
    %54 = arith.addf %50, %53 : vector<16x16xf32>
    %c1_41 = arith.constant 1 : index
    %c0_42 = arith.constant 0 : index
    %c0_43 = arith.constant 0 : index
    %55 = vector.load %arg6[%c1_41, %c0_42, %c0_43] : memref<8x128x16xbf16, #tpu.memory_space<vmem>>, vector<1x128x16xbf16>
    %56 = vector.shape_cast %55 : vector<1x128x16xbf16> to vector<128x16xbf16>
    %cst_44 = arith.constant dense<0.000000e+00> : vector<16x16xf32>
    %57 = tpu.matmul %1, %56, %cst_44 {dimension_numbers = #tpu.dot_dimension_numbers<[1], [0], [0], [1], [0, 0, 1, 1], [], []>} : vector<16x128xbf16>, vector<128x16xbf16>, vector<16x16xf32> -> vector<16x16xf32>
    %c1_45 = arith.constant 1 : index
    %c0_46 = arith.constant 0 : index
    %c0_47 = arith.constant 0 : index
    %58 = vector.load %arg7[%c1_45, %c0_46, %c0_47] : memref<8x1x16xf32, #tpu.memory_space<vmem>>, vector<1x1x16xf32>
    %59 = vector.shape_cast %58 : vector<1x1x16xf32> to vector<1x16xf32>
    %60 = vector.broadcast %59 : vector<1x16xf32> to vector<16x16xf32>
    %61 = arith.addf %57, %60 : vector<16x16xf32>
    %62 = arith.truncf %47 : vector<16x16xf32> to vector<16x16xbf16>
    %63 = arith.truncf %54 : vector<16x16xf32> to vector<16x16xbf16>
    %cst_48 = arith.constant dense<0.000000e+00> : vector<16x16xf32>
    %64 = tpu.matmul %62, %63, %cst_48 {dimension_numbers = #tpu.dot_dimension_numbers<[1], [1], [0], [0], [0, 0, 1, 0], [], []>} : vector<16x16xbf16>, vector<16x16xbf16>, vector<16x16xf32> -> vector<16x16xf32>
    %cst_49 = arith.constant dense<0xFF800000> : vector<16xf32>
    %65 = vector.multi_reduction <maximumf>, %64, %cst_49 [1] : vector<16x16xf32> to vector<16xf32>
    %66 = vector.shape_cast %65 : vector<16xf32> to vector<16x1xf32>
    %67 = vector.broadcast %66 : vector<16x1xf32> to vector<16x16xf32>
    %68 = arith.subf %64, %67 : vector<16x16xf32>
    %69 = math.exp %68 : vector<16x16xf32>
    %cst_50 = arith.constant dense<0.000000e+00> : vector<16xf32>
    %70 = vector.multi_reduction <add>, %69, %cst_50 [1] : vector<16x16xf32> to vector<16xf32>
    %71 = vector.shape_cast %70 : vector<16xf32> to vector<16x1xf32>
    %72 = tpu.reciprocal %71 {approx = true} : vector<16x1xf32> -> vector<16x1xf32>
    %73 = vector.broadcast %72 : vector<16x1xf32> to vector<16x16xf32>
    %74 = arith.mulf %69, %73 : vector<16x16xf32>
    %75 = arith.truncf %74 : vector<16x16xf32> to vector<16x16xbf16>
    %76 = arith.truncf %61 : vector<16x16xf32> to vector<16x16xbf16>
    %cst_51 = arith.constant dense<0.000000e+00> : vector<16x16xf32>
    %77 = tpu.matmul %75, %76, %cst_51 {dimension_numbers = #tpu.dot_dimension_numbers<[1], [0], [0], [1], [0, 0, 1, 1], [], []>} : vector<16x16xbf16>, vector<16x16xbf16>, vector<16x16xf32> -> vector<16x16xf32>
    %78 = arith.truncf %77 : vector<16x16xf32> to vector<16x16xbf16>
    %c0_52 = arith.constant 0 : index
    %c16 = arith.constant 16 : index
    %79 = vector.load %arg11[%c0_52, %c16] : memref<16x128xbf16, #tpu.memory_space<vmem>>, vector<16x16xbf16>
    tpu.vector_store %arg11[%c0_52, %c16], %78 {strides = array<i32>} : memref<16x128xbf16, #tpu.memory_space<vmem>>, vector<16x16xbf16>,
    %c2 = arith.constant 2 : index
    %c0_53 = arith.constant 0 : index
    %c0_54 = arith.constant 0 : index
    %80 = vector.load %arg2[%c2, %c0_53, %c0_54] : memref<8x128x16xbf16, #tpu.memory_space<vmem>>, vector<1x128x16xbf16>
    %81 = vector.shape_cast %80 : vector<1x128x16xbf16> to vector<128x16xbf16>
    %cst_55 = arith.constant dense<0.000000e+00> : vector<16x16xf32>
    %82 = tpu.matmul %1, %81, %cst_55 {dimension_numbers = #tpu.dot_dimension_numbers<[1], [0], [0], [1], [0, 0, 1, 1], [], []>} : vector<16x128xbf16>, vector<128x16xbf16>, vector<16x16xf32> -> vector<16x16xf32>
    %c2_56 = arith.constant 2 : index
    %c0_57 = arith.constant 0 : index
    %c0_58 = arith.constant 0 : index
    %83 = vector.load %arg3[%c2_56, %c0_57, %c0_58] : memref<8x1x16xf32, #tpu.memory_space<vmem>>, vector<1x1x16xf32>
    %84 = vector.shape_cast %83 : vector<1x1x16xf32> to vector<1x16xf32>
    %85 = vector.broadcast %84 : vector<1x16xf32> to vector<16x16xf32>
    %86 = arith.addf %82, %85 : vector<16x16xf32>
    %c2_59 = arith.constant 2 : index
    %c0_60 = arith.constant 0 : index
    %c0_61 = arith.constant 0 : index
    %87 = vector.load %arg4[%c2_59, %c0_60, %c0_61] : memref<8x128x16xbf16, #tpu.memory_space<vmem>>, vector<1x128x16xbf16>
    %88 = vector.shape_cast %87 : vector<1x128x16xbf16> to vector<128x16xbf16>
    %cst_62 = arith.constant dense<0.000000e+00> : vector<16x16xf32>
    %89 = tpu.matmul %1, %88, %cst_62 {dimension_numbers = #tpu.dot_dimension_numbers<[1], [0], [0], [1], [0, 0, 1, 1], [], []>} : vector<16x128xbf16>, vector<128x16xbf16>, vector<16x16xf32> -> vector<16x16xf32>
    %c2_63 = arith.constant 2 : index
    %c0_64 = arith.constant 0 : index
    %c0_65 = arith.constant 0 : index
    %90 = vector.load %arg5[%c2_63, %c0_64, %c0_65] : memref<8x1x16xf32, #tpu.memory_space<vmem>>, vector<1x1x16xf32>
    %91 = vector.shape_cast %90 : vector<1x1x16xf32> to vector<1x16xf32>
    %92 = vector.broadcast %91 : vector<1x16xf32> to vector<16x16xf32>
    %93 = arith.addf %89, %92 : vector<16x16xf32>
    %c2_66 = arith.constant 2 : index
    %c0_67 = arith.constant 0 : index
    %c0_68 = arith.constant 0 : index
    %94 = vector.load %arg6[%c2_66, %c0_67, %c0_68] : memref<8x128x16xbf16, #tpu.memory_space<vmem>>, vector<1x128x16xbf16>
    %95 = vector.shape_cast %94 : vector<1x128x16xbf16> to vector<128x16xbf16>
    %cst_69 = arith.constant dense<0.000000e+00> : vector<16x16xf32>
    %96 = tpu.matmul %1, %95, %cst_69 {dimension_numbers = #tpu.dot_dimension_numbers<[1], [0], [0], [1], [0, 0, 1, 1], [], []>} : vector<16x128xbf16>, vector<128x16xbf16>, vector<16x16xf32> -> vector<16x16xf32>
    %c2_70 = arith.constant 2 : index
    %c0_71 = arith.constant 0 : index
    %c0_72 = arith.constant 0 : index
    %97 = vector.load %arg7[%c2_70, %c0_71, %c0_72] : memref<8x1x16xf32, #tpu.memory_space<vmem>>, vector<1x1x16xf32>
    %98 = vector.shape_cast %97 : vector<1x1x16xf32> to vector<1x16xf32>
    %99 = vector.broadcast %98 : vector<1x16xf32> to vector<16x16xf32>
    %100 = arith.addf %96, %99 : vector<16x16xf32>
    %101 = arith.truncf %86 : vector<16x16xf32> to vector<16x16xbf16>
    %102 = arith.truncf %93 : vector<16x16xf32> to vector<16x16xbf16>
    %cst_73 = arith.constant dense<0.000000e+00> : vector<16x16xf32>
    %103 = tpu.matmul %101, %102, %cst_73 {dimension_numbers = #tpu.dot_dimension_numbers<[1], [1], [0], [0], [0, 0, 1, 0], [], []>} : vector<16x16xbf16>, vector<16x16xbf16>, vector<16x16xf32> -> vector<16x16xf32>
    %cst_74 = arith.constant dense<0xFF800000> : vector<16xf32>
    %104 = vector.multi_reduction <maximumf>, %103, %cst_74 [1] : vector<16x16xf32> to vector<16xf32>
    %105 = vector.shape_cast %104 : vector<16xf32> to vector<16x1xf32>
    %106 = vector.broadcast %105 : vector<16x1xf32> to vector<16x16xf32>
    %107 = arith.subf %103, %106 : vector<16x16xf32>
    %108 = math.exp %107 : vector<16x16xf32>
    %cst_75 = arith.constant dense<0.000000e+00> : vector<16xf32>
    %109 = vector.multi_reduction <add>, %108, %cst_75 [1] : vector<16x16xf32> to vector<16xf32>
    %110 = vector.shape_cast %109 : vector<16xf32> to vector<16x1xf32>
    %111 = tpu.reciprocal %110 {approx = true} : vector<16x1xf32> -> vector<16x1xf32>
    %112 = vector.broadcast %111 : vector<16x1xf32> to vector<16x16xf32>
    %113 = arith.mulf %108, %112 : vector<16x16xf32>
    %114 = arith.truncf %113 : vector<16x16xf32> to vector<16x16xbf16>
    %115 = arith.truncf %100 : vector<16x16xf32> to vector<16x16xbf16>
    %cst_76 = arith.constant dense<0.000000e+00> : vector<16x16xf32>
    %116 = tpu.matmul %114, %115, %cst_76 {dimension_numbers = #tpu.dot_dimension_numbers<[1], [0], [0], [1], [0, 0, 1, 1], [], []>} : vector<16x16xbf16>, vector<16x16xbf16>, vector<16x16xf32> -> vector<16x16xf32>
    %117 = arith.truncf %116 : vector<16x16xf32> to vector<16x16xbf16>
    %c0_77 = arith.constant 0 : index
    %c32 = arith.constant 32 : index
    %118 = vector.load %arg11[%c0_77, %c32] : memref<16x128xbf16, #tpu.memory_space<vmem>>, vector<16x16xbf16>
    tpu.vector_store %arg11[%c0_77, %c32], %117 {strides = array<i32>} : memref<16x128xbf16, #tpu.memory_space<vmem>>, vector<16x16xbf16>,
    %c3 = arith.constant 3 : index
    %c0_78 = arith.constant 0 : index
    %c0_79 = arith.constant 0 : index
    %119 = vector.load %arg2[%c3, %c0_78, %c0_79] : memref<8x128x16xbf16, #tpu.memory_space<vmem>>, vector<1x128x16xbf16>
    %120 = vector.shape_cast %119 : vector<1x128x16xbf16> to vector<128x16xbf16>
    %cst_80 = arith.constant dense<0.000000e+00> : vector<16x16xf32>
    %121 = tpu.matmul %1, %120, %cst_80 {dimension_numbers = #tpu.dot_dimension_numbers<[1], [0], [0], [1], [0, 0, 1, 1], [], []>} : vector<16x128xbf16>, vector<128x16xbf16>, vector<16x16xf32> -> vector<16x16xf32>
    %c3_81 = arith.constant 3 : index
    %c0_82 = arith.constant 0 : index
    %c0_83 = arith.constant 0 : index
    %122 = vector.load %arg3[%c3_81, %c0_82, %c0_83] : memref<8x1x16xf32, #tpu.memory_space<vmem>>, vector<1x1x16xf32>
    %123 = vector.shape_cast %122 : vector<1x1x16xf32> to vector<1x16xf32>
    %124 = vector.broadcast %123 : vector<1x16xf32> to vector<16x16xf32>
    %125 = arith.addf %121, %124 : vector<16x16xf32>
    %c3_84 = arith.constant 3 : index
    %c0_85 = arith.constant 0 : index
    %c0_86 = arith.constant 0 : index
    %126 = vector.load %arg4[%c3_84, %c0_85, %c0_86] : memref<8x128x16xbf16, #tpu.memory_space<vmem>>, vector<1x128x16xbf16>
    %127 = vector.shape_cast %126 : vector<1x128x16xbf16> to vector<128x16xbf16>
    %cst_87 = arith.constant dense<0.000000e+00> : vector<16x16xf32>
    %128 = tpu.matmul %1, %127, %cst_87 {dimension_numbers = #tpu.dot_dimension_numbers<[1], [0], [0], [1], [0, 0, 1, 1], [], []>} : vector<16x128xbf16>, vector<128x16xbf16>, vector<16x16xf32> -> vector<16x16xf32>
    %c3_88 = arith.constant 3 : index
    %c0_89 = arith.constant 0 : index
    %c0_90 = arith.constant 0 : index
    %129 = vector.load %arg5[%c3_88, %c0_89, %c0_90] : memref<8x1x16xf32, #tpu.memory_space<vmem>>, vector<1x1x16xf32>
    %130 = vector.shape_cast %129 : vector<1x1x16xf32> to vector<1x16xf32>
    %131 = vector.broadcast %130 : vector<1x16xf32> to vector<16x16xf32>
    %132 = arith.addf %128, %131 : vector<16x16xf32>
    %c3_91 = arith.constant 3 : index
    %c0_92 = arith.constant 0 : index
    %c0_93 = arith.constant 0 : index
    %133 = vector.load %arg6[%c3_91, %c0_92, %c0_93] : memref<8x128x16xbf16, #tpu.memory_space<vmem>>, vector<1x128x16xbf16>
    %134 = vector.shape_cast %133 : vector<1x128x16xbf16> to vector<128x16xbf16>
    %cst_94 = arith.constant dense<0.000000e+00> : vector<16x16xf32>
    %135 = tpu.matmul %1, %134, %cst_94 {dimension_numbers = #tpu.dot_dimension_numbers<[1], [0], [0], [1], [0, 0, 1, 1], [], []>} : vector<16x128xbf16>, vector<128x16xbf16>, vector<16x16xf32> -> vector<16x16xf32>
    %c3_95 = arith.constant 3 : index
    %c0_96 = arith.constant 0 : index
    %c0_97 = arith.constant 0 : index
    %136 = vector.load %arg7[%c3_95, %c0_96, %c0_97] : memref<8x1x16xf32, #tpu.memory_space<vmem>>, vector<1x1x16xf32>
    %137 = vector.shape_cast %136 : vector<1x1x16xf32> to vector<1x16xf32>
    %138 = vector.broadcast %137 : vector<1x16xf32> to vector<16x16xf32>
    %139 = arith.addf %135, %138 : vector<16x16xf32>
    %140 = arith.truncf %125 : vector<16x16xf32> to vector<16x16xbf16>
    %141 = arith.truncf %132 : vector<16x16xf32> to vector<16x16xbf16>
    %cst_98 = arith.constant dense<0.000000e+00> : vector<16x16xf32>
    %142 = tpu.matmul %140, %141, %cst_98 {dimension_numbers = #tpu.dot_dimension_numbers<[1], [1], [0], [0], [0, 0, 1, 0], [], []>} : vector<16x16xbf16>, vector<16x16xbf16>, vector<16x16xf32> -> vector<16x16xf32>
    %cst_99 = arith.constant dense<0xFF800000> : vector<16xf32>
    %143 = vector.multi_reduction <maximumf>, %142, %cst_99 [1] : vector<16x16xf32> to vector<16xf32>
    %144 = vector.shape_cast %143 : vector<16xf32> to vector<16x1xf32>
    %145 = vector.broadcast %144 : vector<16x1xf32> to vector<16x16xf32>
    %146 = arith.subf %142, %145 : vector<16x16xf32>
    %147 = math.exp %146 : vector<16x16xf32>
    %cst_100 = arith.constant dense<0.000000e+00> : vector<16xf32>
    %148 = vector.multi_reduction <add>, %147, %cst_100 [1] : vector<16x16xf32> to vector<16xf32>
    %149 = vector.shape_cast %148 : vector<16xf32> to vector<16x1xf32>
    %150 = tpu.reciprocal %149 {approx = true} : vector<16x1xf32> -> vector<16x1xf32>
    %151 = vector.broadcast %150 : vector<16x1xf32> to vector<16x16xf32>
    %152 = arith.mulf %147, %151 : vector<16x16xf32>
    %153 = arith.truncf %152 : vector<16x16xf32> to vector<16x16xbf16>
    %154 = arith.truncf %139 : vector<16x16xf32> to vector<16x16xbf16>
    %cst_101 = arith.constant dense<0.000000e+00> : vector<16x16xf32>
    %155 = tpu.matmul %153, %154, %cst_101 {dimension_numbers = #tpu.dot_dimension_numbers<[1], [0], [0], [1], [0, 0, 1, 1], [], []>} : vector<16x16xbf16>, vector<16x16xbf16>, vector<16x16xf32> -> vector<16x16xf32>
    %156 = arith.truncf %155 : vector<16x16xf32> to vector<16x16xbf16>
    %c0_102 = arith.constant 0 : index
    %c48 = arith.constant 48 : index
    %157 = vector.load %arg11[%c0_102, %c48] : memref<16x128xbf16, #tpu.memory_space<vmem>>, vector<16x16xbf16>
    tpu.vector_store %arg11[%c0_102, %c48], %156 {strides = array<i32>} : memref<16x128xbf16, #tpu.memory_space<vmem>>, vector<16x16xbf16>,
    %c4 = arith.constant 4 : index
    %c0_103 = arith.constant 0 : index
    %c0_104 = arith.constant 0 : index
    %158 = vector.load %arg2[%c4, %c0_103, %c0_104] : memref<8x128x16xbf16, #tpu.memory_space<vmem>>, vector<1x128x16xbf16>
    %159 = vector.shape_cast %158 : vector<1x128x16xbf16> to vector<128x16xbf16>
    %cst_105 = arith.constant dense<0.000000e+00> : vector<16x16xf32>
    %160 = tpu.matmul %1, %159, %cst_105 {dimension_numbers = #tpu.dot_dimension_numbers<[1], [0], [0], [1], [0, 0, 1, 1], [], []>} : vector<16x128xbf16>, vector<128x16xbf16>, vector<16x16xf32> -> vector<16x16xf32>
    %c4_106 = arith.constant 4 : index
    %c0_107 = arith.constant 0 : index
    %c0_108 = arith.constant 0 : index
    %161 = vector.load %arg3[%c4_106, %c0_107, %c0_108] : memref<8x1x16xf32, #tpu.memory_space<vmem>>, vector<1x1x16xf32>
    %162 = vector.shape_cast %161 : vector<1x1x16xf32> to vector<1x16xf32>
    %163 = vector.broadcast %162 : vector<1x16xf32> to vector<16x16xf32>
    %164 = arith.addf %160, %163 : vector<16x16xf32>
    %c4_109 = arith.constant 4 : index
    %c0_110 = arith.constant 0 : index
    %c0_111 = arith.constant 0 : index
    %165 = vector.load %arg4[%c4_109, %c0_110, %c0_111] : memref<8x128x16xbf16, #tpu.memory_space<vmem>>, vector<1x128x16xbf16>
    %166 = vector.shape_cast %165 : vector<1x128x16xbf16> to vector<128x16xbf16>
    %cst_112 = arith.constant dense<0.000000e+00> : vector<16x16xf32>
    %167 = tpu.matmul %1, %166, %cst_112 {dimension_numbers = #tpu.dot_dimension_numbers<[1], [0], [0], [1], [0, 0, 1, 1], [], []>} : vector<16x128xbf16>, vector<128x16xbf16>, vector<16x16xf32> -> vector<16x16xf32>
    %c4_113 = arith.constant 4 : index
    %c0_114 = arith.constant 0 : index
    %c0_115 = arith.constant 0 : index
    %168 = vector.load %arg5[%c4_113, %c0_114, %c0_115] : memref<8x1x16xf32, #tpu.memory_space<vmem>>, vector<1x1x16xf32>
    %169 = vector.shape_cast %168 : vector<1x1x16xf32> to vector<1x16xf32>
    %170 = vector.broadcast %169 : vector<1x16xf32> to vector<16x16xf32>
    %171 = arith.addf %167, %170 : vector<16x16xf32>
    %c4_116 = arith.constant 4 : index
    %c0_117 = arith.constant 0 : index
    %c0_118 = arith.constant 0 : index
    %172 = vector.load %arg6[%c4_116, %c0_117, %c0_118] : memref<8x128x16xbf16, #tpu.memory_space<vmem>>, vector<1x128x16xbf16>
    %173 = vector.shape_cast %172 : vector<1x128x16xbf16> to vector<128x16xbf16>
    %cst_119 = arith.constant dense<0.000000e+00> : vector<16x16xf32>
    %174 = tpu.matmul %1, %173, %cst_119 {dimension_numbers = #tpu.dot_dimension_numbers<[1], [0], [0], [1], [0, 0, 1, 1], [], []>} : vector<16x128xbf16>, vector<128x16xbf16>, vector<16x16xf32> -> vector<16x16xf32>
    %c4_120 = arith.constant 4 : index
    %c0_121 = arith.constant 0 : index
    %c0_122 = arith.constant 0 : index
    %175 = vector.load %arg7[%c4_120, %c0_121, %c0_122] : memref<8x1x16xf32, #tpu.memory_space<vmem>>, vector<1x1x16xf32>
    %176 = vector.shape_cast %175 : vector<1x1x16xf32> to vector<1x16xf32>
    %177 = vector.broadcast %176 : vector<1x16xf32> to vector<16x16xf32>
    %178 = arith.addf %174, %177 : vector<16x16xf32>
    %179 = arith.truncf %164 : vector<16x16xf32> to vector<16x16xbf16>
    %180 = arith.truncf %171 : vector<16x16xf32> to vector<16x16xbf16>
    %cst_123 = arith.constant dense<0.000000e+00> : vector<16x16xf32>
    %181 = tpu.matmul %179, %180, %cst_123 {dimension_numbers = #tpu.dot_dimension_numbers<[1], [1], [0], [0], [0, 0, 1, 0], [], []>} : vector<16x16xbf16>, vector<16x16xbf16>, vector<16x16xf32> -> vector<16x16xf32>
    %cst_124 = arith.constant dense<0xFF800000> : vector<16xf32>
    %182 = vector.multi_reduction <maximumf>, %181, %cst_124 [1] : vector<16x16xf32> to vector<16xf32>
    %183 = vector.shape_cast %182 : vector<16xf32> to vector<16x1xf32>
    %184 = vector.broadcast %183 : vector<16x1xf32> to vector<16x16xf32>
    %185 = arith.subf %181, %184 : vector<16x16xf32>
    %186 = math.exp %185 : vector<16x16xf32>
    %cst_125 = arith.constant dense<0.000000e+00> : vector<16xf32>
    %187 = vector.multi_reduction <add>, %186, %cst_125 [1] : vector<16x16xf32> to vector<16xf32>
    %188 = vector.shape_cast %187 : vector<16xf32> to vector<16x1xf32>
    %189 = tpu.reciprocal %188 {approx = true} : vector<16x1xf32> -> vector<16x1xf32>
    %190 = vector.broadcast %189 : vector<16x1xf32> to vector<16x16xf32>
    %191 = arith.mulf %186, %190 : vector<16x16xf32>
    %192 = arith.truncf %191 : vector<16x16xf32> to vector<16x16xbf16>
    %193 = arith.truncf %178 : vector<16x16xf32> to vector<16x16xbf16>
    %cst_126 = arith.constant dense<0.000000e+00> : vector<16x16xf32>
    %194 = tpu.matmul %192, %193, %cst_126 {dimension_numbers = #tpu.dot_dimension_numbers<[1], [0], [0], [1], [0, 0, 1, 1], [], []>} : vector<16x16xbf16>, vector<16x16xbf16>, vector<16x16xf32> -> vector<16x16xf32>
    %195 = arith.truncf %194 : vector<16x16xf32> to vector<16x16xbf16>
    %c0_127 = arith.constant 0 : index
    %c64 = arith.constant 64 : index
    %196 = vector.load %arg11[%c0_127, %c64] : memref<16x128xbf16, #tpu.memory_space<vmem>>, vector<16x16xbf16>
    tpu.vector_store %arg11[%c0_127, %c64], %195 {strides = array<i32>} : memref<16x128xbf16, #tpu.memory_space<vmem>>, vector<16x16xbf16>,
    %c5 = arith.constant 5 : index
    %c0_128 = arith.constant 0 : index
    %c0_129 = arith.constant 0 : index
    %197 = vector.load %arg2[%c5, %c0_128, %c0_129] : memref<8x128x16xbf16, #tpu.memory_space<vmem>>, vector<1x128x16xbf16>
    %198 = vector.shape_cast %197 : vector<1x128x16xbf16> to vector<128x16xbf16>
    %cst_130 = arith.constant dense<0.000000e+00> : vector<16x16xf32>
    %199 = tpu.matmul %1, %198, %cst_130 {dimension_numbers = #tpu.dot_dimension_numbers<[1], [0], [0], [1], [0, 0, 1, 1], [], []>} : vector<16x128xbf16>, vector<128x16xbf16>, vector<16x16xf32> -> vector<16x16xf32>
    %c5_131 = arith.constant 5 : index
    %c0_132 = arith.constant 0 : index
    %c0_133 = arith.constant 0 : index
    %200 = vector.load %arg3[%c5_131, %c0_132, %c0_133] : memref<8x1x16xf32, #tpu.memory_space<vmem>>, vector<1x1x16xf32>
    %201 = vector.shape_cast %200 : vector<1x1x16xf32> to vector<1x16xf32>
    %202 = vector.broadcast %201 : vector<1x16xf32> to vector<16x16xf32>
    %203 = arith.addf %199, %202 : vector<16x16xf32>
    %c5_134 = arith.constant 5 : index
    %c0_135 = arith.constant 0 : index
    %c0_136 = arith.constant 0 : index
    %204 = vector.load %arg4[%c5_134, %c0_135, %c0_136] : memref<8x128x16xbf16, #tpu.memory_space<vmem>>, vector<1x128x16xbf16>
    %205 = vector.shape_cast %204 : vector<1x128x16xbf16> to vector<128x16xbf16>
    %cst_137 = arith.constant dense<0.000000e+00> : vector<16x16xf32>
    %206 = tpu.matmul %1, %205, %cst_137 {dimension_numbers = #tpu.dot_dimension_numbers<[1], [0], [0], [1], [0, 0, 1, 1], [], []>} : vector<16x128xbf16>, vector<128x16xbf16>, vector<16x16xf32> -> vector<16x16xf32>
    %c5_138 = arith.constant 5 : index
    %c0_139 = arith.constant 0 : index
    %c0_140 = arith.constant 0 : index
    %207 = vector.load %arg5[%c5_138, %c0_139, %c0_140] : memref<8x1x16xf32, #tpu.memory_space<vmem>>, vector<1x1x16xf32>
    %208 = vector.shape_cast %207 : vector<1x1x16xf32> to vector<1x16xf32>
    %209 = vector.broadcast %208 : vector<1x16xf32> to vector<16x16xf32>
    %210 = arith.addf %206, %209 : vector<16x16xf32>
    %c5_141 = arith.constant 5 : index
    %c0_142 = arith.constant 0 : index
    %c0_143 = arith.constant 0 : index
    %211 = vector.load %arg6[%c5_141, %c0_142, %c0_143] : memref<8x128x16xbf16, #tpu.memory_space<vmem>>, vector<1x128x16xbf16>
    %212 = vector.shape_cast %211 : vector<1x128x16xbf16> to vector<128x16xbf16>
    %cst_144 = arith.constant dense<0.000000e+00> : vector<16x16xf32>
    %213 = tpu.matmul %1, %212, %cst_144 {dimension_numbers = #tpu.dot_dimension_numbers<[1], [0], [0], [1], [0, 0, 1, 1], [], []>} : vector<16x128xbf16>, vector<128x16xbf16>, vector<16x16xf32> -> vector<16x16xf32>
    %c5_145 = arith.constant 5 : index
    %c0_146 = arith.constant 0 : index
    %c0_147 = arith.constant 0 : index
    %214 = vector.load %arg7[%c5_145, %c0_146, %c0_147] : memref<8x1x16xf32, #tpu.memory_space<vmem>>, vector<1x1x16xf32>
    %215 = vector.shape_cast %214 : vector<1x1x16xf32> to vector<1x16xf32>
    %216 = vector.broadcast %215 : vector<1x16xf32> to vector<16x16xf32>
    %217 = arith.addf %213, %216 : vector<16x16xf32>
    %218 = arith.truncf %203 : vector<16x16xf32> to vector<16x16xbf16>
    %219 = arith.truncf %210 : vector<16x16xf32> to vector<16x16xbf16>
    %cst_148 = arith.constant dense<0.000000e+00> : vector<16x16xf32>
    %220 = tpu.matmul %218, %219, %cst_148 {dimension_numbers = #tpu.dot_dimension_numbers<[1], [1], [0], [0], [0, 0, 1, 0], [], []>} : vector<16x16xbf16>, vector<16x16xbf16>, vector<16x16xf32> -> vector<16x16xf32>
    %cst_149 = arith.constant dense<0xFF800000> : vector<16xf32>
    %221 = vector.multi_reduction <maximumf>, %220, %cst_149 [1] : vector<16x16xf32> to vector<16xf32>
    %222 = vector.shape_cast %221 : vector<16xf32> to vector<16x1xf32>
    %223 = vector.broadcast %222 : vector<16x1xf32> to vector<16x16xf32>
    %224 = arith.subf %220, %223 : vector<16x16xf32>
    %225 = math.exp %224 : vector<16x16xf32>
    %cst_150 = arith.constant dense<0.000000e+00> : vector<16xf32>
    %226 = vector.multi_reduction <add>, %225, %cst_150 [1] : vector<16x16xf32> to vector<16xf32>
    %227 = vector.shape_cast %226 : vector<16xf32> to vector<16x1xf32>
    %228 = tpu.reciprocal %227 {approx = true} : vector<16x1xf32> -> vector<16x1xf32>
    %229 = vector.broadcast %228 : vector<16x1xf32> to vector<16x16xf32>
    %230 = arith.mulf %225, %229 : vector<16x16xf32>
    %231 = arith.truncf %230 : vector<16x16xf32> to vector<16x16xbf16>
    %232 = arith.truncf %217 : vector<16x16xf32> to vector<16x16xbf16>
    %cst_151 = arith.constant dense<0.000000e+00> : vector<16x16xf32>
    %233 = tpu.matmul %231, %232, %cst_151 {dimension_numbers = #tpu.dot_dimension_numbers<[1], [0], [0], [1], [0, 0, 1, 1], [], []>} : vector<16x16xbf16>, vector<16x16xbf16>, vector<16x16xf32> -> vector<16x16xf32>
    %234 = arith.truncf %233 : vector<16x16xf32> to vector<16x16xbf16>
    %c0_152 = arith.constant 0 : index
    %c80 = arith.constant 80 : index
    %235 = vector.load %arg11[%c0_152, %c80] : memref<16x128xbf16, #tpu.memory_space<vmem>>, vector<16x16xbf16>
    tpu.vector_store %arg11[%c0_152, %c80], %234 {strides = array<i32>} : memref<16x128xbf16, #tpu.memory_space<vmem>>, vector<16x16xbf16>,
    %c6 = arith.constant 6 : index
    %c0_153 = arith.constant 0 : index
    %c0_154 = arith.constant 0 : index
    %236 = vector.load %arg2[%c6, %c0_153, %c0_154] : memref<8x128x16xbf16, #tpu.memory_space<vmem>>, vector<1x128x16xbf16>
    %237 = vector.shape_cast %236 : vector<1x128x16xbf16> to vector<128x16xbf16>
    %cst_155 = arith.constant dense<0.000000e+00> : vector<16x16xf32>
    %238 = tpu.matmul %1, %237, %cst_155 {dimension_numbers = #tpu.dot_dimension_numbers<[1], [0], [0], [1], [0, 0, 1, 1], [], []>} : vector<16x128xbf16>, vector<128x16xbf16>, vector<16x16xf32> -> vector<16x16xf32>
    %c6_156 = arith.constant 6 : index
    %c0_157 = arith.constant 0 : index
    %c0_158 = arith.constant 0 : index
    %239 = vector.load %arg3[%c6_156, %c0_157, %c0_158] : memref<8x1x16xf32, #tpu.memory_space<vmem>>, vector<1x1x16xf32>
    %240 = vector.shape_cast %239 : vector<1x1x16xf32> to vector<1x16xf32>
    %241 = vector.broadcast %240 : vector<1x16xf32> to vector<16x16xf32>
    %242 = arith.addf %238, %241 : vector<16x16xf32>
    %c6_159 = arith.constant 6 : index
    %c0_160 = arith.constant 0 : index
    %c0_161 = arith.constant 0 : index
    %243 = vector.load %arg4[%c6_159, %c0_160, %c0_161] : memref<8x128x16xbf16, #tpu.memory_space<vmem>>, vector<1x128x16xbf16>
    %244 = vector.shape_cast %243 : vector<1x128x16xbf16> to vector<128x16xbf16>
    %cst_162 = arith.constant dense<0.000000e+00> : vector<16x16xf32>
    %245 = tpu.matmul %1, %244, %cst_162 {dimension_numbers = #tpu.dot_dimension_numbers<[1], [0], [0], [1], [0, 0, 1, 1], [], []>} : vector<16x128xbf16>, vector<128x16xbf16>, vector<16x16xf32> -> vector<16x16xf32>
    %c6_163 = arith.constant 6 : index
    %c0_164 = arith.constant 0 : index
    %c0_165 = arith.constant 0 : index
    %246 = vector.load %arg5[%c6_163, %c0_164, %c0_165] : memref<8x1x16xf32, #tpu.memory_space<vmem>>, vector<1x1x16xf32>
    %247 = vector.shape_cast %246 : vector<1x1x16xf32> to vector<1x16xf32>
    %248 = vector.broadcast %247 : vector<1x16xf32> to vector<16x16xf32>
    %249 = arith.addf %245, %248 : vector<16x16xf32>
    %c6_166 = arith.constant 6 : index
    %c0_167 = arith.constant 0 : index
    %c0_168 = arith.constant 0 : index
    %250 = vector.load %arg6[%c6_166, %c0_167, %c0_168] : memref<8x128x16xbf16, #tpu.memory_space<vmem>>, vector<1x128x16xbf16>
    %251 = vector.shape_cast %250 : vector<1x128x16xbf16> to vector<128x16xbf16>
    %cst_169 = arith.constant dense<0.000000e+00> : vector<16x16xf32>
    %252 = tpu.matmul %1, %251, %cst_169 {dimension_numbers = #tpu.dot_dimension_numbers<[1], [0], [0], [1], [0, 0, 1, 1], [], []>} : vector<16x128xbf16>, vector<128x16xbf16>, vector<16x16xf32> -> vector<16x16xf32>
    %c6_170 = arith.constant 6 : index
    %c0_171 = arith.constant 0 : index
    %c0_172 = arith.constant 0 : index
    %253 = vector.load %arg7[%c6_170, %c0_171, %c0_172] : memref<8x1x16xf32, #tpu.memory_space<vmem>>, vector<1x1x16xf32>
    %254 = vector.shape_cast %253 : vector<1x1x16xf32> to vector<1x16xf32>
    %255 = vector.broadcast %254 : vector<1x16xf32> to vector<16x16xf32>
    %256 = arith.addf %252, %255 : vector<16x16xf32>
    %257 = arith.truncf %242 : vector<16x16xf32> to vector<16x16xbf16>
    %258 = arith.truncf %249 : vector<16x16xf32> to vector<16x16xbf16>
    %cst_173 = arith.constant dense<0.000000e+00> : vector<16x16xf32>
    %259 = tpu.matmul %257, %258, %cst_173 {dimension_numbers = #tpu.dot_dimension_numbers<[1], [1], [0], [0], [0, 0, 1, 0], [], []>} : vector<16x16xbf16>, vector<16x16xbf16>, vector<16x16xf32> -> vector<16x16xf32>
    %cst_174 = arith.constant dense<0xFF800000> : vector<16xf32>
    %260 = vector.multi_reduction <maximumf>, %259, %cst_174 [1] : vector<16x16xf32> to vector<16xf32>
    %261 = vector.shape_cast %260 : vector<16xf32> to vector<16x1xf32>
    %262 = vector.broadcast %261 : vector<16x1xf32> to vector<16x16xf32>
    %263 = arith.subf %259, %262 : vector<16x16xf32>
    %264 = math.exp %263 : vector<16x16xf32>
    %cst_175 = arith.constant dense<0.000000e+00> : vector<16xf32>
    %265 = vector.multi_reduction <add>, %264, %cst_175 [1] : vector<16x16xf32> to vector<16xf32>
    %266 = vector.shape_cast %265 : vector<16xf32> to vector<16x1xf32>
    %267 = tpu.reciprocal %266 {approx = true} : vector<16x1xf32> -> vector<16x1xf32>
    %268 = vector.broadcast %267 : vector<16x1xf32> to vector<16x16xf32>
    %269 = arith.mulf %264, %268 : vector<16x16xf32>
    %270 = arith.truncf %269 : vector<16x16xf32> to vector<16x16xbf16>
    %271 = arith.truncf %256 : vector<16x16xf32> to vector<16x16xbf16>
    %cst_176 = arith.constant dense<0.000000e+00> : vector<16x16xf32>
    %272 = tpu.matmul %270, %271, %cst_176 {dimension_numbers = #tpu.dot_dimension_numbers<[1], [0], [0], [1], [0, 0, 1, 1], [], []>} : vector<16x16xbf16>, vector<16x16xbf16>, vector<16x16xf32> -> vector<16x16xf32>
    %273 = arith.truncf %272 : vector<16x16xf32> to vector<16x16xbf16>
    %c0_177 = arith.constant 0 : index
    %c96 = arith.constant 96 : index
    %274 = vector.load %arg11[%c0_177, %c96] : memref<16x128xbf16, #tpu.memory_space<vmem>>, vector<16x16xbf16>
    tpu.vector_store %arg11[%c0_177, %c96], %273 {strides = array<i32>} : memref<16x128xbf16, #tpu.memory_space<vmem>>, vector<16x16xbf16>,
    %c7 = arith.constant 7 : index
    %c0_178 = arith.constant 0 : index
    %c0_179 = arith.constant 0 : index
    %275 = vector.load %arg2[%c7, %c0_178, %c0_179] : memref<8x128x16xbf16, #tpu.memory_space<vmem>>, vector<1x128x16xbf16>
    %276 = vector.shape_cast %275 : vector<1x128x16xbf16> to vector<128x16xbf16>
    %cst_180 = arith.constant dense<0.000000e+00> : vector<16x16xf32>
    %277 = tpu.matmul %1, %276, %cst_180 {dimension_numbers = #tpu.dot_dimension_numbers<[1], [0], [0], [1], [0, 0, 1, 1], [], []>} : vector<16x128xbf16>, vector<128x16xbf16>, vector<16x16xf32> -> vector<16x16xf32>
    %c7_181 = arith.constant 7 : index
    %c0_182 = arith.constant 0 : index
    %c0_183 = arith.constant 0 : index
    %278 = vector.load %arg3[%c7_181, %c0_182, %c0_183] : memref<8x1x16xf32, #tpu.memory_space<vmem>>, vector<1x1x16xf32>
    %279 = vector.shape_cast %278 : vector<1x1x16xf32> to vector<1x16xf32>
    %280 = vector.broadcast %279 : vector<1x16xf32> to vector<16x16xf32>
    %281 = arith.addf %277, %280 : vector<16x16xf32>
    %c7_184 = arith.constant 7 : index
    %c0_185 = arith.constant 0 : index
    %c0_186 = arith.constant 0 : index
    %282 = vector.load %arg4[%c7_184, %c0_185, %c0_186] : memref<8x128x16xbf16, #tpu.memory_space<vmem>>, vector<1x128x16xbf16>
    %283 = vector.shape_cast %282 : vector<1x128x16xbf16> to vector<128x16xbf16>
    %cst_187 = arith.constant dense<0.000000e+00> : vector<16x16xf32>
    %284 = tpu.matmul %1, %283, %cst_187 {dimension_numbers = #tpu.dot_dimension_numbers<[1], [0], [0], [1], [0, 0, 1, 1], [], []>} : vector<16x128xbf16>, vector<128x16xbf16>, vector<16x16xf32> -> vector<16x16xf32>
    %c7_188 = arith.constant 7 : index
    %c0_189 = arith.constant 0 : index
    %c0_190 = arith.constant 0 : index
    %285 = vector.load %arg5[%c7_188, %c0_189, %c0_190] : memref<8x1x16xf32, #tpu.memory_space<vmem>>, vector<1x1x16xf32>
    %286 = vector.shape_cast %285 : vector<1x1x16xf32> to vector<1x16xf32>
    %287 = vector.broadcast %286 : vector<1x16xf32> to vector<16x16xf32>
    %288 = arith.addf %284, %287 : vector<16x16xf32>
    %c7_191 = arith.constant 7 : index
    %c0_192 = arith.constant 0 : index
    %c0_193 = arith.constant 0 : index
    %289 = vector.load %arg6[%c7_191, %c0_192, %c0_193] : memref<8x128x16xbf16, #tpu.memory_space<vmem>>, vector<1x128x16xbf16>
    %290 = vector.shape_cast %289 : vector<1x128x16xbf16> to vector<128x16xbf16>
    %cst_194 = arith.constant dense<0.000000e+00> : vector<16x16xf32>
    %291 = tpu.matmul %1, %290, %cst_194 {dimension_numbers = #tpu.dot_dimension_numbers<[1], [0], [0], [1], [0, 0, 1, 1], [], []>} : vector<16x128xbf16>, vector<128x16xbf16>, vector<16x16xf32> -> vector<16x16xf32>
    %c7_195 = arith.constant 7 : index
    %c0_196 = arith.constant 0 : index
    %c0_197 = arith.constant 0 : index
    %292 = vector.load %arg7[%c7_195, %c0_196, %c0_197] : memref<8x1x16xf32, #tpu.memory_space<vmem>>, vector<1x1x16xf32>
    %293 = vector.shape_cast %292 : vector<1x1x16xf32> to vector<1x16xf32>
    %294 = vector.broadcast %293 : vector<1x16xf32> to vector<16x16xf32>
    %295 = arith.addf %291, %294 : vector<16x16xf32>
    %296 = arith.truncf %281 : vector<16x16xf32> to vector<16x16xbf16>
    %297 = arith.truncf %288 : vector<16x16xf32> to vector<16x16xbf16>
    %cst_198 = arith.constant dense<0.000000e+00> : vector<16x16xf32>
    %298 = tpu.matmul %296, %297, %cst_198 {dimension_numbers = #tpu.dot_dimension_numbers<[1], [1], [0], [0], [0, 0, 1, 0], [], []>} : vector<16x16xbf16>, vector<16x16xbf16>, vector<16x16xf32> -> vector<16x16xf32>
    %cst_199 = arith.constant dense<0xFF800000> : vector<16xf32>
    %299 = vector.multi_reduction <maximumf>, %298, %cst_199 [1] : vector<16x16xf32> to vector<16xf32>
    %300 = vector.shape_cast %299 : vector<16xf32> to vector<16x1xf32>
    %301 = vector.broadcast %300 : vector<16x1xf32> to vector<16x16xf32>
    %302 = arith.subf %298, %301 : vector<16x16xf32>
    %303 = math.exp %302 : vector<16x16xf32>
    %cst_200 = arith.constant dense<0.000000e+00> : vector<16xf32>
    %304 = vector.multi_reduction <add>, %303, %cst_200 [1] : vector<16x16xf32> to vector<16xf32>
    %305 = vector.shape_cast %304 : vector<16xf32> to vector<16x1xf32>
    %306 = tpu.reciprocal %305 {approx = true} : vector<16x1xf32> -> vector<16x1xf32>
    %307 = vector.broadcast %306 : vector<16x1xf32> to vector<16x16xf32>
    %308 = arith.mulf %303, %307 : vector<16x16xf32>
    %309 = arith.truncf %308 : vector<16x16xf32> to vector<16x16xbf16>
    %310 = arith.truncf %295 : vector<16x16xf32> to vector<16x16xbf16>
    %cst_201 = arith.constant dense<0.000000e+00> : vector<16x16xf32>
    %311 = tpu.matmul %309, %310, %cst_201 {dimension_numbers = #tpu.dot_dimension_numbers<[1], [0], [0], [1], [0, 0, 1, 1], [], []>} : vector<16x16xbf16>, vector<16x16xbf16>, vector<16x16xf32> -> vector<16x16xf32>
    %312 = arith.truncf %311 : vector<16x16xf32> to vector<16x16xbf16>
    %c0_202 = arith.constant 0 : index
    %c112 = arith.constant 112 : index
    %313 = vector.load %arg11[%c0_202, %c112] : memref<16x128xbf16, #tpu.memory_space<vmem>>, vector<16x16xbf16>
    tpu.vector_store %arg11[%c0_202, %c112], %312 {strides = array<i32>} : memref<16x128xbf16, #tpu.memory_space<vmem>>, vector<16x16xbf16>,
    %c0_203 = arith.constant 0 : index
    %c0_204 = arith.constant 0 : index
    %314 = vector.load %arg11[%c0_203, %c0_204] : memref<16x128xbf16, #tpu.memory_space<vmem>>, vector<16x128xbf16>
    %c0_205 = arith.constant 0 : index
    %c0_206 = arith.constant 0 : index
    %315 = vector.load %arg8[%c0_205, %c0_206] : memref<128x128xbf16, #tpu.memory_space<vmem>>, vector<128x128xbf16>
    %cst_207 = arith.constant dense<0.000000e+00> : vector<16x128xf32>
    %316 = tpu.matmul %314, %315, %cst_207 {dimension_numbers = #tpu.dot_dimension_numbers<[1], [0], [0], [1], [0, 0, 1, 1], [], []>} : vector<16x128xbf16>, vector<128x128xbf16>, vector<16x128xf32> -> vector<16x128xf32>
    %c0_208 = arith.constant 0 : index
    %c0_209 = arith.constant 0 : index
    %317 = vector.load %arg9[%c0_208, %c0_209] : memref<1x128xf32, #tpu.memory_space<vmem>>, vector<1x128xf32>
    %318 = vector.shape_cast %317 : vector<1x128xf32> to vector<128xf32>
    %319 = vector.shape_cast %318 : vector<128xf32> to vector<1x128xf32>
    %320 = vector.broadcast %319 : vector<1x128xf32> to vector<16x128xf32>
    %321 = arith.addf %316, %320 : vector<16x128xf32>
    %c0_210 = arith.constant 0 : index
    %c0_211 = arith.constant 0 : index
    %c0_212 = arith.constant 0 : index
    %322 = vector.load %arg10[%c0_210, %c0_211, %c0_212] : memref<1x16x128xf32, #tpu.memory_space<vmem>>, vector<1x16x128xf32>
    %323 = vector.shape_cast %322 : vector<1x16x128xf32> to vector<16x128xf32>
    %324 = vector.shape_cast %321 : vector<16x128xf32> to vector<1x16x128xf32>
    tpu.vector_store %arg10[%c0_210, %c0_211, %c0_212], %324 {strides = array<i32>} : memref<1x16x128xf32, #tpu.memory_space<vmem>>, vector<1x16x128xf32>,
    return
  }
  func.func @transform_0(%arg0: i32) -> (i32, i32, i32) {
    %c0_i32 = arith.constant 0 : i32
    %c0_i32_0 = arith.constant 0 : i32
    %c0_i32_1 = arith.constant 0 : i32
    return %arg0, %c0_i32, %c0_i32_0 : i32, i32, i32
  }
  func.func @transform_1(%arg0: i32) -> (i32, i32, i32) {
    %c0_i32 = arith.constant 0 : i32
    %c0_i32_0 = arith.constant 0 : i32
    %c0_i32_1 = arith.constant 0 : i32
    %c0_i32_2 = arith.constant 0 : i32
    return %c0_i32, %c0_i32_0, %c0_i32_1 : i32, i32, i32
  }
  func.func @transform_2(%arg0: i32) -> (i32, i32, i32) {
    %c0_i32 = arith.constant 0 : i32
    %c0_i32_0 = arith.constant 0 : i32
    %c0_i32_1 = arith.constant 0 : i32
    %c0_i32_2 = arith.constant 0 : i32
    return %c0_i32, %c0_i32_0, %c0_i32_1 : i32, i32, i32
  }
  func.func @transform_3(%arg0: i32) -> (i32, i32, i32) {
    %c0_i32 = arith.constant 0 : i32
    %c0_i32_0 = arith.constant 0 : i32
    %c0_i32_1 = arith.constant 0 : i32
    %c0_i32_2 = arith.constant 0 : i32
    return %c0_i32, %c0_i32_0, %c0_i32_1 : i32, i32, i32
  }
  func.func @transform_4(%arg0: i32) -> (i32, i32, i32) {
    %c0_i32 = arith.constant 0 : i32
    %c0_i32_0 = arith.constant 0 : i32
    %c0_i32_1 = arith.constant 0 : i32
    %c0_i32_2 = arith.constant 0 : i32
    return %c0_i32, %c0_i32_0, %c0_i32_1 : i32, i32, i32
  }
  func.func @transform_5(%arg0: i32) -> (i32, i32, i32) {
    %c0_i32 = arith.constant 0 : i32
    %c0_i32_0 = arith.constant 0 : i32
    %c0_i32_1 = arith.constant 0 : i32
    %c0_i32_2 = arith.constant 0 : i32
    return %c0_i32, %c0_i32_0, %c0_i32_1 : i32, i32, i32
  }
  func.func @transform_6(%arg0: i32) -> (i32, i32, i32) {
    %c0_i32 = arith.constant 0 : i32
    %c0_i32_0 = arith.constant 0 : i32
    %c0_i32_1 = arith.constant 0 : i32
    %c0_i32_2 = arith.constant 0 : i32
    return %c0_i32, %c0_i32_0, %c0_i32_1 : i32, i32, i32
  }
  func.func @transform_7(%arg0: i32) -> (i32, i32) {
    %c0_i32 = arith.constant 0 : i32
    %c0_i32_0 = arith.constant 0 : i32
    %c0_i32_1 = arith.constant 0 : i32
    return %c0_i32, %c0_i32_0 : i32, i32
  }
  func.func @transform_8(%arg0: i32) -> (i32, i32) {
    %c0_i32 = arith.constant 0 : i32
    %c0_i32_0 = arith.constant 0 : i32
    %c0_i32_1 = arith.constant 0 : i32
    return %c0_i32, %c0_i32_0 : i32, i32
  }
  func.func @transform_9(%arg0: i32) -> (i32, i32, i32) {
    %c0_i32 = arith.constant 0 : i32
    %c0_i32_0 = arith.constant 0 : i32
    %c0_i32_1 = arith.constant 0 : i32
    return %arg0, %c0_i32, %c0_i32_0 : i32, i32, i32
  }
}

</mosaic_0001>

<bundles_post_ra>
// kernel: tpu_custom_call.1
= control target key start
LH: loop header
LB: loop body
LE: loop exit
PB: predicated region body
PF: predicated region fallthrough
CT: control target
= control target key end

     0   :  { %14 = vsyncpa [#allocation4], 0  ;;  %s5683_s0 = inlined_call_operand.vmem [shape: bf16[2,16,128], index: 0, kind: input, shape index: {}]   ;;  %s5684_s1 = inlined_call_operand.vmem [shape: bf16[8,128,16], index: 1, kind: input, shape index: {}]   ;;  %s5685_s2 = inlined_call_operand.vmem [shape: f32[8,1,16], index: 2, kind: input, shape index: {}]   ;;  %s5686_s3 = inlined_call_operand.vmem [shape: bf16[8,128,16], index: 3, kind: input, shape index: {}]   ;;  %s5687_s4 = inlined_call_operand.vmem [shape: f32[8,1,16], index: 4, kind: input, shape index: {}]   ;;  %s5688_s5 = inlined_call_operand.vmem [shape: bf16[8,128,16], index: 5, kind: input, shape index: {}]   ;;  %s5689_s6 = inlined_call_operand.vmem [shape: f32[8,1,16], index: 6, kind: input, shape index: {}]   ;;  %s5690_s7 = inlined_call_operand.vmem [shape: bf16[128,128], index: 7, kind: input, shape index: {}]   ;;  %s5691_s8 = inlined_call_operand.vmem [shape: f32[1,128], index: 8, kind: input, shape index: {}]   ;;  %s5692_s9 = inlined_call_operand.hbm [shape: f32[2,16,128], index: 9, kind: output, shape index: {}]  }
   0x1   :  { %16 = vsyncpa [#allocation4 + $0x1], 0  ;;  %s4779_s30 = smov 0   ;;  %s4781_s10 = smov 0  }
   0x2   :  { %s4783_s11 = smov 0   ;;  %s4785_s12 = smov 0  }
   0x3 LB: > { %s4800_s13 = sadd.s32 4294967295, %s4718_s12   ;;  %s3121_s14 = sadd.s32 4294967294, %s4718_s12   ;;  %s4718_s12 = sphi %s4785_s12, %s5698_s12   ;;  %s4714_s11 = sphi %s4783_s11, %s5697_s11   ;;  %s4710_s10 = sphi %s4781_s10, %s5696_s10   ;;  %s4706_s30 = sphi %s4779_s30, %s5695_s30  }
   0x4   : > { %s4804_s15 = sadd.s32 1, %s4718_s12   ;;  %s223_s16 = sadd.s32 1, %s4714_s11 }
   0x5   : > { %s220_s17 = ssub.s32 %s4718_s12, %s4804_s15  ;;  %p233_p0 = scmp.ne.s32.totalorder %s4714_s11, %s4710_s10 }
   0x6   : > { %p221_p1 = scmp.eq.s32.totalorder %s220_s17, 0  ;;  %p234_p2 = scmp.eq.s32.totalorder %s4800_s13, 1 }
   0x7   : > { %p239_p3 = scmp.ne.s32.totalorder %s4710_s10, %s4706_s30  ;;  %p240_p4 = scmp.eq.s32.totalorder %s3121_s14, 1 }
   0x8   : > { %s4815_s18 = scalar_select %p221_p1, %s4714_s11, %s223_s16  }
   0x9   : > { %p4817_p5 = por %p234_p2, %p233_p0  ;;  %p4821_p6 = por %p240_p4, %p239_p3 }
   0xa   : > { %p3124_p7 = scmp.ge.s32.totalorder %s4718_s12, 1  ;;  %p290_p8 = scmp.lt.s32.totalorder %s4718_s12, 3 }
   0xc   : > { %p291_p9 = pnand %p3124_p7, %p290_p8 }
   0xd   : > { %p326_p10 = scmp.lt.s32.totalorder (!%p291_p9), %s4800_s13, 1  ;;  %s4720_s24 = smov (!%p291_p9), 16  }
   0xe   : > { %294 = sbr.rel (%p291_p9) target bundleno = 4026 (0xfba), region = 56  ;;  %s4721_s14 = smov (!%p291_p9), 32  }
   0xf   : > { %s4722_s25 = smov (!%p291_p9), 48   ;;  %s4725_s23 = smov (!%p291_p9), 64  }
  0x13   : > { %v4331_v0 = vld [vmem:[%s5686_s3 + $0x38] sm:$0xff]  ;;  %v4330_v2 = vld [vmem:[%s5686_s3 + $0x30] sm:$0xff]  ;;  %v4329_v4 = vld [vmem:[%s5686_s3 + $0x28] sm:$0xff]  ;;  %s327_s21 = scalar_select %p326_p10, %s4800_s13, 1  ;;  %vm588_vm0 = vcmask 130048   ;;  %vm652_vm1 = vcmask 125952  }
  0x14   : > { %v4323_v1 = vld [vmem:[%s5684_s1 + $0x38] sm:$0xff]  ;;  %490 = vmatpush.bf16.msra.mxu1 %v4331_v0  ;;  %v4322_v3 = vld [vmem:[%s5684_s1 + $0x30] sm:$0xff]  ;;  %v4321_v5 = vld [vmem:[%s5684_s1 + $0x28] sm:$0xff]  ;;  %vm980_vm2 = vcmask 257152   ;;  %vm1308_vm3 = vcmask 388352   ;;  %vm1636_vm4 = vcmask 519552  }
  0x15   : > { %408 = vmatpush.bf16.msra.mxu0 %v4323_v1  ;;  %v4328_v6 = vld [vmem:[%s5686_s3 + $0x20] sm:$0xff]  ;;  %v4327_v8 = vld [vmem:[%s5686_s3 + $0x18] sm:$0xff]  ;;  %v4326_v10 = vld [vmem:[%s5686_s3 + $0x10] sm:$0xff]  ;;  %s4314_s26 = sshll.u32 %s327_s21, 3  ;;  %s4724_s21 = smov 96   ;;  %vm1964_vm5 = vcmask 650752  }
  0x16   : > { %v4320_v7 = vld [vmem:[%s5684_s1 + $0x20] sm:$0xff]  ;;  %v4319_v9 = vld [vmem:[%s5684_s1 + $0x18] sm:$0xff]  ;;  %v4318_v11 = vld [vmem:[%s5684_s1 + $0x10] sm:$0xff]  ;;  %s4877_s16 = scalar_lea.vmem %s5683_s0, %s4314_s26  ;;  %vm2292_vm6 = vcmask 781952   ;;  %vm2620_vm7 = vcmask 913152   ;;  %vm2948_vm8 = vcmask 1044352  }
  0x17   : > { %v4325_v12 = vld [vmem:[%s5686_s3 + $0x8] sm:$0xff]  ;;  %v4324_v14 = vld [vmem:[%s5686_s3] sm:$0xff]  ;;  %v4339_v30 = vld [vmem:[%s5688_s5 + $0x38] sm:$0xff] }
  0x18   : > { %491 = vmatpush.bf16.msra.mxu1 %v4330_v2  ;;  %v4317_v13 = vld [vmem:[%s5684_s1 + $0x8] sm:$0xff]  ;;  %v4316_v15 = vld [vmem:[%s5684_s1] sm:$0xff]  ;;  %572 = vmatpush.bf16.msra.mxu2 %v4339_v30  ;;  %v4338_v31 = vld [vmem:[%s5688_s5 + $0x30] sm:$0xff] }
  0x19   : > { %409 = vmatpush.bf16.msra.mxu0 %v4322_v3  ;;  %v4883_v16 = vld [vmem:[%s4877_s16] sm:$0xff]  ;;  %v4337_v32 = vld [vmem:[%s5688_s5 + $0x28] sm:$0xff]  ;;  %v4335_v34 = vld [vmem:[%s5688_s5 + $0x18] sm:$0xff] }
  0x1a   : > { %v4566_v19 = vld [vmem:[%s5687_s4] ss:$0 sm:$0xff]  ;;  %v4334_v35 = vld [vmem:[%s5688_s5 + $0x10] sm:$0xff]  ;;  %v4333_v37 = vld [vmem:[%s5688_s5 + $0x8] sm:$0xff] }
  0x1b   : > { %v4567_v23 = vld [vmem:[%s5685_s2] ss:$0 sm:$0xff]  ;;  %v4355_v42 = vld [vmem:[%s5686_s3 + $0x78] sm:$0xff]  ;;  %v4354_v45 = vld [vmem:[%s5686_s3 + $0x70] sm:$0xff] }
  0x1c   : > { %492 = vmatpush.bf16.msra.mxu1 %v4329_v4  ;;  %573 = vmatpush.bf16.msra.mxu2 %v4338_v31  ;;  %v4336_v33 = vld [vmem:[%s5688_s5 + $0x20] sm:$0xff]  ;;  %v4353_v60 = vld [vmem:[%s5686_s3 + $0x68] sm:$0xff]  ;;  %v4347_v61 = vld [vmem:[%s5684_s1 + $0x78] sm:$0xff] }
  0x1d   : > { %410 = vmatpush.bf16.msra.mxu0 %v4321_v5  ;;  %v4332_v39 = vld [vmem:[%s5688_s5] sm:$0xff]  ;;  %v4346_v63 = vld [vmem:[%s5684_s1 + $0x70] sm:$0xff]  ;;  %v4351_v0 = vld [vmem:[%s5686_s3 + $0x58] sm:$0xff] }
  0x1e   : > { %v4568_v55 = vld [vmem:[%s5689_s6] ss:$0 sm:$0xff]  ;;  %v4345_v1 = vld [vmem:[%s5684_s1 + $0x68] sm:$0xff]  ;;  %v4350_v2 = vld [vmem:[%s5686_s3 + $0x50] sm:$0xff] }
  0x1f   : > { %v4352_v62 = vld [vmem:[%s5686_s3 + $0x60] sm:$0xff]  ;;  %v4349_v4 = vld [vmem:[%s5686_s3 + $0x48] sm:$0xff]  ;;  %v4343_v5 = vld [vmem:[%s5684_s1 + $0x58] sm:$0xff] }
  0x20   : > { %493 = vmatpush.bf16.msra.mxu1 %v4328_v6  ;;  %574 = vmatpush.bf16.msra.mxu2 %v4337_v32  ;;  %v4344_v3 = vld [vmem:[%s5684_s1 + $0x60] sm:$0xff] }
  0x21   : > { %411 = vmatpush.bf16.msra.mxu0 %v4320_v7  ;;  %v4348_v6 = vld [vmem:[%s5686_s3 + $0x40] sm:$0xff]  ;;  %v4342_v7 = vld [vmem:[%s5684_s1 + $0x50] sm:$0xff] }
  0x22   : > { %v4570_v30 = vld [vmem:[%s5685_s2 + $0x1] ss:$0 sm:$0xff] }
  0x24   : > { %494 = vmatpush.bf16.msra.mxu1 %v4327_v8  ;;  %575 = vmatpush.bf16.msra.mxu2 %v4336_v33  ;;  %v4341_v8 = vld [vmem:[%s5684_s1 + $0x48] sm:$0xff] }
  0x25   : > { %412 = vmatpush.bf16.msra.mxu0 %v4319_v9  ;;  %v4340_v9 = vld [vmem:[%s5684_s1 + $0x40] sm:$0xff] }
  0x28   : > { %495 = vmatpush.bf16.msra.mxu1 %v4326_v10  ;;  %576 = vmatpush.bf16.msra.mxu2 %v4335_v34 }
  0x29   : > { %413 = vmatpush.bf16.msra.mxu0 %v4318_v11 }
  0x2c   : > { %496 = vmatpush.bf16.msra.mxu1 %v4325_v12  ;;  %577 = vmatpush.bf16.msra.mxu2 %v4334_v35  ;;  %v4363_v35 = vld [vmem:[%s5688_s5 + $0x78] sm:$0xff] }
  0x2d   : > { %414 = vmatpush.bf16.msra.mxu0 %v4317_v13 }
  0x30   : > { %497 = vmatpush.bf16.msra.mxu1 %v4324_v14  ;;  %578 = vmatpush.bf16.msra.mxu2 %v4333_v37  ;;  %v4362_v37 = vld [vmem:[%s5688_s5 + $0x70] sm:$0xff] }
  0x31   : > { %415 = vmatpush.bf16.msra.mxu0 %v4316_v15 }
  0x33   : > { %498 = vmatmul.bf16.vlgmr.msra.gmra.mxu1 %v4883_v16 }
  0x34   : > { %416 = vmatmul.bf16.vlgmr.msra.gmra.mxu0 %v4883_v16  ;;  %579 = vmatpush.bf16.msra.mxu2 %v4332_v39  ;;  %v4371_v39 = vld [vmem:[%s5684_s1 + $0xb8] sm:$0xff] }
  0x35   : > { %893 = vmatpush.bf16.msrb.mxu1 %v4363_v35 }
  0x37   : > { %580 = vmatmul.bf16.vlgmr.msra.gmra.mxu2 %v4883_v16 }
  0x39   : > { %894 = vmatpush.bf16.msrb.mxu1 %v4362_v37  ;;  %v4403_v37 = vld [vmem:[%s5686_s3 + $0xf8] sm:$0xff] }
  0xb0   : > { %v499_v17 = vpop.f32.mrf.mxu1 }
  0xb1   : > { %v417_v18 = vpop.f32.mrf.mxu0  ;;  %v500_v21 = vadd.f32 %v4566_v19, %v499_v17 }
  0xb2   : > { %v418_v27 = vadd.f32 %v4567_v23, %v417_v18 }
  0xb8   : > { %v501_v20 = vpop.f32.mrf.mxu1 }
  0xb9   : > { %v502_v22 = vadd.f32 %v4566_v19, %v501_v20  ;;  %v419_v25 = vpop.f32.mrf.mxu0  ;;  %v4569_v19 = vld [vmem:[%s5687_s4 + $0x1] ss:$0 sm:$0xff] }
  0xba   : > { %v420_v28 = vadd.f32 %v4567_v23, %v419_v25  ;;  %v581_v54 = vpop.f32.mrf.mxu2 }
  0xbb   : > { %v587_v24 = vpack.c.bf16 %v502_v22, %v500_v21  ;;  %v582_v57 = vadd.f32 %v4568_v55, %v581_v54 }
  0xbc   : > { %v586_v29 = vpack.c.bf16 %v420_v28, %v418_v27 }
  0xbd   : > { %v593_v26 = vsel %vm588_vm0, %v587_v24, 0 }
  0xbe   : > { %602 = vmatpush.bf16.xpose.msrb.mxu0 %v593_v26 }
  0xc2   : > { %v583_v56 = vpop.f32.mrf.mxu2 }
  0xc3   : > { %v584_v58 = vadd.f32 %v4568_v55, %v583_v56  ;;  %v4368_v56 = vld [vmem:[%s5684_s1 + $0xa0] sm:$0xff] }
  0xc5   : > { %3228 = vmatmul.msk.bf16.vlgmr.msrb.gmra.mxu0 %vm588_vm0, %v586_v29  ;;  %v632_v59 = vpack.c.bf16 %v584_v58, %v582_v57  ;;  %v4367_v57 = vld [vmem:[%s5684_s1 + $0x98] sm:$0xff]  ;;  %v4366_v58 = vld [vmem:[%s5684_s1 + $0x90] sm:$0xff] }
  0xc6   : > { %809 = vmatpush.bf16.msra.mxu0 %v4355_v42  ;;  %v4377_v42 = vld [vmem:[%s5686_s3 + $0xa8] sm:$0xff] }
  0xc7   : > { %643 = vmatpush.bf16.msra.mxu3 %v632_v59  ;;  %v4373_v59 = vld [vmem:[%s5686_s3 + $0x88] sm:$0xff] }
  0xca   : > { %810 = vmatpush.bf16.msra.mxu0 %v4354_v45  ;;  %v4376_v45 = vld [vmem:[%s5686_s3 + $0xa0] sm:$0xff] }
  0xcb   : > { %725 = vmatpush.bf16.msrb.mxu3 %v4347_v61  ;;  %v4372_v61 = vld [vmem:[%s5686_s3 + $0x80] sm:$0xff] }
  0xce   : > { %811 = vmatpush.bf16.msra.mxu0 %v4353_v60  ;;  %v4365_v60 = vld [vmem:[%s5684_s1 + $0x88] sm:$0xff] }
  0xcf   : > { %726 = vmatpush.bf16.msrb.mxu3 %v4346_v63 }
  0xd2   : > { %812 = vmatpush.bf16.msra.mxu0 %v4352_v62  ;;  %v4364_v62 = vld [vmem:[%s5684_s1 + $0x80] sm:$0xff] }
  0xd3   : > { %727 = vmatpush.bf16.msrb.mxu3 %v4345_v1 }
  0xd6   : > { %813 = vmatpush.bf16.msra.mxu0 %v4351_v0 }
  0xd7   : > { %728 = vmatpush.bf16.msrb.mxu3 %v4344_v3 }
  0xda   : > { %814 = vmatpush.bf16.msra.mxu0 %v4350_v2 }
  0xdb   : > { %729 = vmatpush.bf16.msrb.mxu3 %v4343_v5 }
  0xde   : > { %815 = vmatpush.bf16.msra.mxu0 %v4349_v4 }
  0xdf   : > { %730 = vmatpush.bf16.msrb.mxu3 %v4342_v7 }
  0xe2   : > { %816 = vmatpush.bf16.msra.mxu0 %v4348_v6 }
  0xe3   : > { %731 = vmatpush.bf16.msrb.mxu3 %v4341_v8 }
  0xe5   : > { %817 = vmatmul.bf16.vlgmr.msra.gmra.mxu0 %v4883_v16 }
  0xe7   : > { %732 = vmatpush.bf16.msrb.mxu3 %v4340_v9 }
 0x142   : > { %v604_v36 = vpop.f32.mrf.mxu0 }
 0x143   : > { %v609_v38 = vsel %vm588_vm0, %v604_v36, -inf }
 0x144   : > { %610 = vmax.xlane.f32.xlu0 %v609_v38  ;;  %v4378_v38 = vld [vmem:[%s5686_s3 + $0xb0] sm:$0xff] }
 0x14a   : > { %v606_v40 = vpop.f32.mrf.mxu0 }
 0x14b   : > { %v612_v41 = vsel %vm588_vm0, %v606_v40, -inf }
 0x14c   : > { %613 = vmax.xlane.f32.xlu0 %v612_v41  ;;  %v4361_v41 = vld [vmem:[%s5688_s5 + $0x68] sm:$0xff] }
 0x14d   : > { %895 = vmatpush.bf16.msrb.mxu1 %v4361_v41  ;;  %v4394_v41 = vld [vmem:[%s5684_s1 + $0xf0] sm:$0xff] }
 0x162   : > { %v818_v18 = vpop.f32.mrf.mxu0 }
 0x163   : > { %v819_v20 = vadd.f32 %v4569_v19, %v818_v18 }
 0x16a   : > { %v820_v21 = vpop.f32.mrf.mxu0 }
 0x16b   : > { %v821_v22 = vadd.f32 %v4569_v19, %v820_v21 }
 0x16d   : > { %v908_v23 = vpack.c.bf16 %v821_v22, %v819_v20 }
 0x16f   : > { %v913_v24 = vsel %vm588_vm0, %v908_v23, 0 }
 0x170   : > { %922 = vmatpush.bf16.xpose.msrb.mxu2 %v913_v24 }
 0x1b7   : > { %v611_v43 = vpop.xlane.xlu0 %610 }
 0x1b8   : > { %v615_v44 = vsub.f32 %v604_v36, %v611_v43  ;;  %v4379_v36 = vld [vmem:[%s5686_s3 + $0xb8] sm:$0xff]  ;;  %v4369_v43 = vld [vmem:[%s5684_s1 + $0xa8] sm:$0xff] }
 0x1b9   : > { %1137 = vmatpush.bf16.msrb.mxu0 %v4379_v36  ;;  %v4387_v36 = vld [vmem:[%s5688_s5 + $0xb8] sm:$0xff] }
 0x1ba   : > { %v617_v46 = vmul.f32 1.442695, %v615_v44  ;;  %v4360_v44 = vld [vmem:[%s5688_s5 + $0x60] sm:$0xff] }
 0x1bb   : > { %896 = vmatpush.bf16.msrb.mxu1 %v4360_v44  ;;  %v4401_v44 = vld [vmem:[%s5686_s3 + $0xe8] sm:$0xff] }
 0x1bc   : > { %4591 = vpow2.f32 %v617_v46  ;;  %v4359_v46 = vld [vmem:[%s5688_s5 + $0x58] sm:$0xff] }
 0x1bd   : > { %1138 = vmatpush.bf16.msrb.mxu0 %v4378_v38  ;;  %v4386_v38 = vld [vmem:[%s5688_s5 + $0xb0] sm:$0xff] }
 0x1bf   : > { %v614_v47 = vpop.xlane.xlu0 %613  ;;  %897 = vmatpush.bf16.msrb.mxu1 %v4359_v46  ;;  %v4384_v46 = vld [vmem:[%s5688_s5 + $0xa0] sm:$0xff] }
 0x1c0   : > { %v616_v48 = vsub.f32 %v606_v40, %v614_v47  ;;  %v4370_v40 = vld [vmem:[%s5684_s1 + $0xb0] sm:$0xff]  ;;  %v4375_v47 = vld [vmem:[%s5686_s3 + $0x98] sm:$0xff] }
 0x1c1   : > { %1139 = vmatpush.bf16.msrb.mxu0 %v4377_v42 }
 0x1c2   : > { %v4592_v49 = vpop.eup %4591  ;;  %v619_v50 = vmul.f32 1.442695, %v616_v48  ;;  %v4358_v48 = vld [vmem:[%s5688_s5 + $0x50] sm:$0xff] }
 0x1c3   : > { %v621_v51 = vsel %vm588_vm0, %v4592_v49, 0.0  ;;  %898 = vmatpush.bf16.msrb.mxu1 %v4358_v48 }
 0x1c4   : > { %4593 = vpow2.f32 %v619_v50  ;;  %622 = vadd.xlane.f32.xlu1 %v621_v51  ;;  %v4357_v51 = vld [vmem:[%s5688_s5 + $0x48] sm:$0xff] }
 0x1c5   : > { %1140 = vmatpush.bf16.msrb.mxu0 %v4376_v45  ;;  %v4393_v45 = vld [vmem:[%s5684_s1 + $0xe8] sm:$0xff] }
 0x1c7   : > { %899 = vmatpush.bf16.msrb.mxu1 %v4357_v51  ;;  %v4382_v51 = vld [vmem:[%s5688_s5 + $0x90] sm:$0xff] }
 0x1c9   : > { %1141 = vmatpush.bf16.msrb.mxu0 %v4375_v47  ;;  %v4400_v47 = vld [vmem:[%s5686_s3 + $0xe0] sm:$0xff] }
 0x1ca   : > { %v4594_v52 = vpop.eup %4593 }
 0x1cb   : > { %v624_v53 = vsel %vm588_vm0, %v4594_v52, 0.0 }
 0x1cc   : > { %625 = vadd.xlane.f32.xlu1 %v624_v53  ;;  %v4356_v53 = vld [vmem:[%s5688_s5 + $0x40] sm:$0xff] }
 0x1cd   : > { %900 = vmatpush.bf16.msrb.mxu1 %v4356_v53 }
 0x1d0   : > { %901 = vmatmul.bf16.vlgmr.msrb.gmra.mxu1 %v4883_v16 }
 0x1d1   : > { %1221 = vmatpush.bf16.msra.mxu1 %v4387_v36 }
 0x1d5   : > { %1222 = vmatpush.bf16.msra.mxu1 %v4386_v38 }
 0x237   : > { %v623_v10 = vpop.xlane.xlu1 %622 }
 0x238   : > { %4595 = vrcp.f32 %v623_v10  ;;  %v4571_v10 = vld [vmem:[%s5689_s6 + $0x1] ss:$0 sm:$0xff] }
 0x23e   : > { %v4596_v12 = vpop.eup %4595 }
 0x23f   : > { %v626_v11 = vpop.xlane.xlu1 %625  ;;  %v629_v14 = vmul.f32 %v4596_v12, %v4592_v49  ;;  %v4374_v49 = vld [vmem:[%s5686_s3 + $0x90] sm:$0xff] }
 0x240   : > { %4597 = vrcp.f32 %v626_v11  ;;  %1142 = vmatpush.bf16.msrb.mxu0 %v4374_v49  ;;  %v4383_v49 = vld [vmem:[%s5688_s5 + $0x98] sm:$0xff] }
 0x244   : > { %1143 = vmatpush.bf16.msrb.mxu0 %v4373_v59  ;;  %v4392_v59 = vld [vmem:[%s5684_s1 + $0xe0] sm:$0xff] }
 0x246   : > { %v4598_v13 = vpop.eup %4597 }
 0x247   : > { %v630_v15 = vmul.f32 %v4598_v13, %v4594_v52 }
 0x248   : > { %1144 = vmatpush.bf16.msrb.mxu0 %v4372_v61  ;;  %v4390_v61 = vld [vmem:[%s5684_s1 + $0xd0] sm:$0xff] }
 0x249   : > { %v631_v17 = vpack.c.bf16 %v630_v15, %v629_v14 }
 0x24b   : > { %3229 = vmatmul.msk.bf16.vlgmr.msra.gmra.mxu3 %vm588_vm0, %v631_v17  ;;  %1145 = vmatmul.bf16.vlgmr.msrb.gmra.mxu0 %v4883_v16  ;;  %v4572_v17 = vld [vmem:[%s5687_s4 + $0x2] ss:$0 sm:$0xff] }
 0x24c   : > { %1053 = vmatpush.bf16.msra.mxu3 %v4371_v39  ;;  %1465 = vmatpush.bf16.msra.mxu0 %v4403_v37  ;;  %v4402_v39 = vld [vmem:[%s5686_s3 + $0xf0] sm:$0xff] }
 0x24d   : > { %v902_v8 = vpop.f32.mrf.mxu1 }
 0x24e   : > { %v903_v11 = vadd.f32 %v4571_v10, %v902_v8 }
 0x250   : > { %1054 = vmatpush.bf16.msra.mxu3 %v4370_v40  ;;  %v4395_v40 = vld [vmem:[%s5684_s1 + $0xf8] sm:$0xff]  ;;  %1466 = vmatpush.bf16.msra.mxu0 %v4402_v39 }
 0x251   : > { %v4411_v39 = vld [vmem:[%s5688_s5 + $0xf8] sm:$0xff] }
 0x254   : > { %1055 = vmatpush.bf16.msra.mxu3 %v4369_v43  ;;  %v4385_v43 = vld [vmem:[%s5688_s5 + $0xa8] sm:$0xff]  ;;  %1467 = vmatpush.bf16.msra.mxu0 %v4401_v44  ;;  %v4419_v44 = vld [vmem:[%s5684_s1 + $0x138] sm:$0xff] }
 0x255   : > { %v904_v12 = vpop.f32.mrf.mxu1  ;;  %1223 = vmatpush.bf16.msra.mxu1 %v4385_v43  ;;  %v4426_v43 = vld [vmem:[%s5686_s3 + $0x130] sm:$0xff] }
 0x256   : > { %v905_v13 = vadd.f32 %v4571_v10, %v904_v12 }
 0x258   : > { %1056 = vmatpush.bf16.msra.mxu3 %v4368_v56  ;;  %v952_v14 = vpack.c.bf16 %v905_v13, %v903_v11  ;;  %1468 = vmatpush.bf16.msra.mxu0 %v4400_v47  ;;  %v4380_v56 = vld [vmem:[%s5688_s5 + $0x80] sm:$0xff]  ;;  %v4409_v47 = vld [vmem:[%s5688_s5 + $0xe8] sm:$0xff] }
 0x259   : > { %1224 = vmatpush.bf16.msra.mxu1 %v4384_v46  ;;  %v4574_v13 = vld [vmem:[%s5689_s6 + $0x2] ss:$0 sm:$0xff] }
 0x25a   : > { %963 = vmatpush.bf16.msra.mxu2 %v952_v14 }
 0x25b   : > { %733 = vmatmul.bf16.vlgmr.msrb.gmra.mxu3 %v4883_v16 }
 0x25c   : > { %1057 = vmatpush.bf16.msra.mxu3 %v4367_v57 }
 0x25d   : > { %1225 = vmatpush.bf16.msra.mxu1 %v4383_v49  ;;  %v4425_v49 = vld [vmem:[%s5686_s3 + $0x128] sm:$0xff] }
 0x260   : > { %1058 = vmatpush.bf16.msra.mxu3 %v4366_v58 }
 0x261   : > { %1226 = vmatpush.bf16.msra.mxu1 %v4382_v51  ;;  %v4408_v51 = vld [vmem:[%s5688_s5 + $0xe0] sm:$0xff] }
 0x264   : > { %1059 = vmatpush.bf16.msra.mxu3 %v4365_v60  ;;  %v4391_v60 = vld [vmem:[%s5684_s1 + $0xd8] sm:$0xff] }
 0x268   : > { %1060 = vmatpush.bf16.msra.mxu3 %v4364_v62  ;;  %v4397_v62 = vld [vmem:[%s5686_s3 + $0xc8] sm:$0xff] }
 0x26b   : > { %1061 = vmatmul.bf16.vlgmr.msra.gmra.mxu3 %v4883_v16 }
 0x26c   : > { %1381 = vmatpush.bf16.msrb.mxu3 %v4395_v40  ;;  %v4427_v40 = vld [vmem:[%s5686_s3 + $0x138] sm:$0xff] }
 0x270   : > { %1382 = vmatpush.bf16.msrb.mxu3 %v4394_v41  ;;  %v4410_v41 = vld [vmem:[%s5688_s5 + $0xf0] sm:$0xff] }
 0x274   : > { %1383 = vmatpush.bf16.msrb.mxu3 %v4393_v45  ;;  %v4418_v45 = vld [vmem:[%s5684_s1 + $0x130] sm:$0xff] }
 0x278   : > { %1384 = vmatpush.bf16.msrb.mxu3 %v4392_v59  ;;  %v4405_v59 = vld [vmem:[%s5688_s5 + $0xc8] sm:$0xff] }
 0x27c   : > { %1385 = vmatpush.bf16.msrb.mxu3 %v4391_v60 }
 0x280   : > { %1386 = vmatpush.bf16.msrb.mxu3 %v4390_v61  ;;  %v4404_v61 = vld [vmem:[%s5688_s5 + $0xc0] sm:$0xff] }
 0x2c8   : > { %v1146_v15 = vpop.f32.mrf.mxu0 }
 0x2c9   : > { %v1147_v18 = vadd.f32 %v4572_v17, %v1146_v15 }
 0x2ce   : > { %v645_v25 = vpop.f32.mrf.mxu3 }
 0x2cf   : > { %v650_v26 = vpack.c.bf16 %v645_v25, %v645_v25 }
 0x2d0   : > { %v1148_v19 = vpop.f32.mrf.mxu0 }
 0x2d1   : > { %653 = vst.msk [vmem:[#allocation2] sm:$0xf] %vm652_vm1, %v650_v26  ;;  %v1149_v20 = vadd.f32 %v4572_v17, %v1148_v19 }
 0x2d3   : > { %v1236_v21 = vpack.c.bf16 %v1149_v20, %v1147_v18  ;;  %v4575_v20 = vld [vmem:[%s5687_s4 + $0x3] ss:$0 sm:$0xff] }
 0x2d5   : > { %v1241_v22 = vsel %vm588_vm0, %v1236_v21, 0 }
 0x2d6   : > { %v647_v27 = vpop.f32.mrf.mxu3 }
 0x2d7   : > { %v651_v28 = vpack.c.bf16 %v647_v27, %v647_v27 }
 0x2d9   : > { %654 = vst.msk [vmem:[#allocation2 + $0x4] sm:$0xf] %vm652_vm1, %v651_v28 }
 0x2de   : > { %v734_v29 = vpop.f32.mrf.mxu3 }
 0x2df   : > { %v735_v32 = vadd.f32 %v4570_v30, %v734_v29 }
 0x2e6   : > { %v736_v31 = vpop.f32.mrf.mxu3 }
 0x2e7   : > { %v737_v33 = vadd.f32 %v4570_v30, %v736_v31  ;;  %v4573_v31 = vld [vmem:[%s5685_s2 + $0x2] ss:$0 sm:$0xff] }
 0x2e9   : > { %v907_v34 = vpack.c.bf16 %v737_v33, %v735_v32 }
 0x2eb   : > { %3377 = vmatmul.msk.bf16.vlgmr.msrb.gmra.mxu2 %vm588_vm0, %v907_v34 }
 0x2ec   : > { %1250 = vmatpush.bf16.xpose.msrb.mxu2 %v1241_v22 }
 0x2ee   : > { %v1062_v29 = vpop.f32.mrf.mxu3 }
 0x2ef   : > { %v1063_v33 = vadd.f32 %v4573_v31, %v1062_v29 }
 0x2f6   : > { %v1064_v32 = vpop.f32.mrf.mxu3 }
 0x2f7   : > { %v1065_v34 = vadd.f32 %v4573_v31, %v1064_v32 }
 0x2f9   : > { %v1235_v35 = vpack.c.bf16 %v1065_v34, %v1063_v33  ;;  %v4576_v34 = vld [vmem:[%s5685_s2 + $0x3] ss:$0 sm:$0xff] }
 0x36e   : > { %v924_v50 = vpop.f32.mrf.mxu2 }
 0x36f   : > { %v929_v52 = vsel %vm588_vm0, %v924_v50, -inf }
 0x370   : > { %930 = vmax.xlane.f32.xlu2 %v929_v52  ;;  %v4398_v52 = vld [vmem:[%s5686_s3 + $0xd0] sm:$0xff] }
 0x376   : > { %v926_v54 = vpop.f32.mrf.mxu2 }
 0x377   : > { %v932_v55 = vsel %vm588_vm0, %v926_v54, -inf }
 0x378   : > { %933 = vmax.xlane.f32.xlu2 %v932_v55 }
 0x3e3   : > { %v931_v63 = vpop.xlane.xlu2 %930 }
 0x3e4   : > { %v935_v0 = vsub.f32 %v924_v50, %v931_v63  ;;  %v4399_v50 = vld [vmem:[%s5686_s3 + $0xd8] sm:$0xff]  ;;  %v4389_v63 = vld [vmem:[%s5684_s1 + $0xc8] sm:$0xff] }
 0x3e5   : > { %1469 = vmatpush.bf16.msra.mxu0 %v4399_v50  ;;  %1387 = vmatpush.bf16.msrb.mxu3 %v4389_v63  ;;  %v4417_v50 = vld [vmem:[%s5684_s1 + $0x128] sm:$0xff] }
 0x3e6   : > { %v937_v1 = vmul.f32 1.442695, %v935_v0  ;;  %v4396_v0 = vld [vmem:[%s5686_s3 + $0xc0] sm:$0xff] }
 0x3e8   : > { %4599 = vpow2.f32 %v937_v1  ;;  %v4388_v1 = vld [vmem:[%s5684_s1 + $0xc0] sm:$0xff] }
 0x3e9   : > { %1470 = vmatpush.bf16.msra.mxu0 %v4398_v52  ;;  %1388 = vmatpush.bf16.msrb.mxu3 %v4388_v1  ;;  %v4424_v52 = vld [vmem:[%s5686_s3 + $0x120] sm:$0xff]  ;;  %v4415_v1 = vld [vmem:[%s5684_s1 + $0x118] sm:$0xff] }
 0x3eb   : > { %v934_v2 = vpop.xlane.xlu2 %933 }
 0x3ec   : > { %v936_v3 = vsub.f32 %v926_v54, %v934_v2  ;;  %v4381_v54 = vld [vmem:[%s5688_s5 + $0x88] sm:$0xff]  ;;  %1389 = vmatmul.bf16.vlgmr.msrb.gmra.mxu3 %v4883_v16 }
 0x3ed   : > { %1227 = vmatpush.bf16.msra.mxu1 %v4381_v54  ;;  %1471 = vmatpush.bf16.msra.mxu0 %v4397_v62  ;;  %v4407_v54 = vld [vmem:[%s5688_s5 + $0xd8] sm:$0xff] }
 0x3ee   : > { %v4600_v4 = vpop.eup %4599  ;;  %v939_v5 = vmul.f32 1.442695, %v936_v3  ;;  %1709 = vmatpush.bf16.msra.mxu3 %v4419_v44 }
 0x3ef   : > { %v941_v6 = vsel %vm588_vm0, %v4600_v4, 0.0 }
 0x3f0   : > { %4601 = vpow2.f32 %v939_v5  ;;  %942 = vadd.xlane.f32.xlu0 %v941_v6 }
 0x3f1   : > { %1228 = vmatpush.bf16.msra.mxu1 %v4380_v56  ;;  %1472 = vmatpush.bf16.msra.mxu0 %v4396_v0  ;;  %v4406_v56 = vld [vmem:[%s5688_s5 + $0xd0] sm:$0xff]  ;;  %v4416_v0 = vld [vmem:[%s5684_s1 + $0x120] sm:$0xff] }
 0x3f2   : > { %1710 = vmatpush.bf16.msra.mxu3 %v4418_v45  ;;  %v4435_v45 = vld [vmem:[%s5688_s5 + $0x138] sm:$0xff] }
 0x3f4   : > { %1229 = vmatmul.bf16.vlgmr.msra.gmra.mxu1 %v4883_v16  ;;  %1473 = vmatmul.bf16.vlgmr.msra.gmra.mxu0 %v4883_v16 }
 0x3f5   : > { %1549 = vmatpush.bf16.msrb.mxu1 %v4411_v39  ;;  %1793 = vmatpush.bf16.msrb.mxu0 %v4427_v40  ;;  %v4579_v39 = vld [vmem:[%s5685_s2 + $0x4] ss:$0 sm:$0xff] }
 0x3f6   : > { %v4602_v7 = vpop.eup %4601  ;;  %1711 = vmatpush.bf16.msra.mxu3 %v4417_v50  ;;  %v4450_v50 = vld [vmem:[%s5686_s3 + $0x170] sm:$0xff] }
 0x3f7   : > { %v944_v9 = vsel %vm588_vm0, %v4602_v7, 0.0 }
 0x3f8   : > { %945 = vadd.xlane.f32.xlu1 %v944_v9 }
 0x3f9   : > { %1550 = vmatpush.bf16.msrb.mxu1 %v4410_v41  ;;  %1794 = vmatpush.bf16.msrb.mxu0 %v4426_v43 }
 0x3fa   : > { %1712 = vmatpush.bf16.msra.mxu3 %v4416_v0  ;;  %v4446_v0 = vld [vmem:[%s5686_s3 + $0x150] sm:$0xff] }
 0x3fd   : > { %1551 = vmatpush.bf16.msrb.mxu1 %v4409_v47  ;;  %1795 = vmatpush.bf16.msrb.mxu0 %v4425_v49  ;;  %v4451_v47 = vld [vmem:[%s5686_s3 + $0x178] sm:$0xff]  ;;  %v4434_v49 = vld [vmem:[%s5688_s5 + $0x130] sm:$0xff] }
 0x3fe   : > { %1713 = vmatpush.bf16.msra.mxu3 %v4415_v1 }
 0x401   : > { %1552 = vmatpush.bf16.msrb.mxu1 %v4408_v51  ;;  %1796 = vmatpush.bf16.msrb.mxu0 %v4424_v52  ;;  %v4443_v51 = vld [vmem:[%s5684_s1 + $0x178] sm:$0xff]  ;;  %v4442_v52 = vld [vmem:[%s5684_s1 + $0x170] sm:$0xff] }
 0x405   : > { %1553 = vmatpush.bf16.msrb.mxu1 %v4407_v54 }
 0x409   : > { %1554 = vmatpush.bf16.msrb.mxu1 %v4406_v56  ;;  %v4449_v56 = vld [vmem:[%s5686_s3 + $0x168] sm:$0xff] }
 0x40d   : > { %1555 = vmatpush.bf16.msrb.mxu1 %v4405_v59  ;;  %v4448_v59 = vld [vmem:[%s5686_s3 + $0x160] sm:$0xff] }
 0x411   : > { %1556 = vmatpush.bf16.msrb.mxu1 %v4404_v61  ;;  %v4431_v61 = vld [vmem:[%s5688_s5 + $0x118] sm:$0xff] }
 0x414   : > { %1557 = vmatmul.bf16.vlgmr.msrb.gmra.mxu1 %v4883_v16 }
 0x415   : > { %1877 = vmatpush.bf16.msra.mxu1 %v4435_v45 }
 0x419   : > { %1878 = vmatpush.bf16.msra.mxu1 %v4434_v49 }
 0x463   : > { %v943_v23 = vpop.xlane.xlu0 %942 }
 0x464   : > { %4603 = vrcp.f32 %v943_v23 }
 0x46a   : > { %v4604_v25 = vpop.eup %4603 }
 0x46b   : > { %v946_v24 = vpop.xlane.xlu1 %945  ;;  %v949_v27 = vmul.f32 %v4604_v25, %v4600_v4 }
 0x46c   : > { %4605 = vrcp.f32 %v946_v24 }
 0x46f   : > { %v1390_v32 = vpop.f32.mrf.mxu3 }
 0x470   : > { %v1391_v36 = vadd.f32 %v4576_v34, %v1390_v32 }
 0x471   : > { %v1230_v11 = vpop.f32.mrf.mxu1  ;;  %v1474_v19 = vpop.f32.mrf.mxu0 }
 0x472   : > { %v4606_v26 = vpop.eup %4605  ;;  %v1231_v14 = vadd.f32 %v4574_v13, %v1230_v11  ;;  %v1475_v21 = vadd.f32 %v4575_v20, %v1474_v19  ;;  %v4577_v19 = vld [vmem:[%s5689_s6 + $0x3] ss:$0 sm:$0xff] }
 0x473   : > { %v950_v28 = vmul.f32 %v4606_v26, %v4602_v7 }
 0x475   : > { %v951_v30 = vpack.c.bf16 %v950_v28, %v949_v27 }
 0x477   : > { %3378 = vmatmul.msk.bf16.vlgmr.msra.gmra.mxu2 %vm588_vm0, %v951_v30 }
 0x479   : > { %v1232_v15 = vpop.f32.mrf.mxu1  ;;  %v1476_v22 = vpop.f32.mrf.mxu0 }
 0x47a   : > { %v1233_v17 = vadd.f32 %v4574_v13, %v1232_v15  ;;  %v1477_v23 = vadd.f32 %v4575_v20, %v1476_v22 }
 0x47c   : > { %v1280_v18 = vpack.c.bf16 %v1233_v17, %v1231_v14  ;;  %v1564_v24 = vpack.c.bf16 %v1477_v23, %v1475_v21 }
 0x47e   : > { %1291 = vmatpush.bf16.msra.mxu2 %v1280_v18  ;;  %v1569_v25 = vsel %vm588_vm0, %v1564_v24, 0 }
 0x487   : > { %3526 = vmatmul.msk.bf16.vlgmr.msrb.gmra.mxu2 %vm588_vm0, %v1235_v35  ;;  %v1392_v35 = vpop.f32.mrf.mxu3 }
 0x488   : > { %1578 = vmatpush.bf16.xpose.msrb.mxu2 %v1569_v25  ;;  %v1393_v37 = vadd.f32 %v4576_v34, %v1392_v35  ;;  %v4578_v25 = vld [vmem:[%s5687_s4 + $0x4] ss:$0 sm:$0xff] }
 0x48a   : > { %v1563_v38 = vpack.c.bf16 %v1393_v37, %v1391_v36 }
 0x491   : > { %v1558_v17 = vpop.f32.mrf.mxu1 }
 0x492   : > { %v1559_v20 = vadd.f32 %v4577_v19, %v1558_v17 }
 0x499   : > { %v1560_v21 = vpop.f32.mrf.mxu1 }
 0x49a   : > { %v1561_v22 = vadd.f32 %v4577_v19, %v1560_v21 }
 0x49c   : > { %v1608_v23 = vpack.c.bf16 %v1561_v22, %v1559_v20 }
 0x4fa   : > { %v5095_v42 = vpop.f32.mrf.mxu2 }
 0x502   : > { %v5112_v48 = vpop.f32.mrf.mxu2 }
 0x50a   : > { %v1252_v53 = vpop.f32.mrf.mxu2 }
 0x50b   : > { %v1257_v55 = vsel %vm588_vm0, %v1252_v53, -inf }
 0x50c   : > { %1258 = vmax.xlane.f32.xlu2 %v1257_v55  ;;  %v4423_v55 = vld [vmem:[%s5686_s3 + $0x118] sm:$0xff] }
 0x50d   : > { %1797 = vmatpush.bf16.msrb.mxu0 %v4423_v55  ;;  %v4433_v55 = vld [vmem:[%s5688_s5 + $0x128] sm:$0xff] }
 0x50e   : > { %1879 = vmatpush.bf16.msra.mxu1 %v4433_v55  ;;  %v4459_v55 = vld [vmem:[%s5688_s5 + $0x178] sm:$0xff] }
 0x512   : > { %v1254_v57 = vpop.f32.mrf.mxu2 }
 0x513   : > { %v1260_v58 = vsel %vm588_vm0, %v1254_v57, -inf }
 0x514   : > { %1261 = vmax.xlane.f32.xlu0 %v1260_v58 }
 0x57f   : > { %v1259_v2 = vpop.xlane.xlu2 %1258 }
 0x580   : > { %v1263_v3 = vsub.f32 %v1252_v53, %v1259_v2  ;;  %v4414_v2 = vld [vmem:[%s5684_s1 + $0x110] sm:$0xff] }
 0x581   : > { %1714 = vmatpush.bf16.msra.mxu3 %v4414_v2  ;;  %v4429_v2 = vld [vmem:[%s5688_s5 + $0x108] sm:$0xff] }
 0x582   : > { %v1265_v4 = vmul.f32 1.442695, %v1263_v3  ;;  %v4421_v3 = vld [vmem:[%s5686_s3 + $0x108] sm:$0xff] }
 0x584   : > { %4607 = vpow2.f32 %v1265_v4  ;;  %v4413_v4 = vld [vmem:[%s5684_s1 + $0x108] sm:$0xff] }
 0x585   : > { %1715 = vmatpush.bf16.msra.mxu3 %v4413_v4  ;;  %v4428_v4 = vld [vmem:[%s5688_s5 + $0x100] sm:$0xff] }
 0x587   : > { %v1262_v5 = vpop.xlane.xlu0 %1261 }
 0x588   : > { %v1264_v6 = vsub.f32 %v1254_v57, %v1262_v5  ;;  %v4422_v57 = vld [vmem:[%s5686_s3 + $0x110] sm:$0xff]  ;;  %v4420_v5 = vld [vmem:[%s5686_s3 + $0x100] sm:$0xff] }
 0x589   : > { %1798 = vmatpush.bf16.msrb.mxu0 %v4422_v57  ;;  %v4441_v57 = vld [vmem:[%s5684_s1 + $0x168] sm:$0xff] }
 0x58a   : > { %v4608_v7 = vpop.eup %4607  ;;  %v1267_v8 = vmul.f32 1.442695, %v1264_v6  ;;  %v4412_v6 = vld [vmem:[%s5684_s1 + $0x100] sm:$0xff] }
 0x58b   : > { %v1269_v9 = vsel %vm588_vm0, %v4608_v7, 0.0  ;;  %1716 = vmatpush.bf16.msra.mxu3 %v4412_v6 }
 0x58c   : > { %4609 = vpow2.f32 %v1267_v8  ;;  %1270 = vadd.xlane.f32.xlu1 %v1269_v9 }
 0x58d   : > { %1799 = vmatpush.bf16.msrb.mxu0 %v4421_v3 }
 0x58e   : > { %1717 = vmatmul.bf16.vlgmr.msra.gmra.mxu3 %v4883_v16 }
 0x58f   : > { %2037 = vmatpush.bf16.msrb.mxu3 %v4443_v51 }
 0x591   : > { %1800 = vmatpush.bf16.msrb.mxu0 %v4420_v5 }
 0x592   : > { %v4610_v10 = vpop.eup %4609 }
 0x593   : > { %v1272_v12 = vsel %vm588_vm0, %v4610_v10, 0.0  ;;  %2038 = vmatpush.bf16.msrb.mxu3 %v4442_v52 }
 0x594   : > { %1273 = vadd.xlane.f32.xlu2 %v1272_v12  ;;  %1801 = vmatmul.bf16.vlgmr.msrb.gmra.mxu0 %v4883_v16 }
 0x595   : > { %2121 = vmatpush.bf16.msra.mxu0 %v4451_v47  ;;  %v4582_v47 = vld [vmem:[%s5685_s2 + $0x5] ss:$0 sm:$0xff] }
 0x597   : > { %2039 = vmatpush.bf16.msrb.mxu3 %v4441_v57  ;;  %v4458_v57 = vld [vmem:[%s5688_s5 + $0x170] sm:$0xff] }
 0x599   : > { %2122 = vmatpush.bf16.msra.mxu0 %v4450_v50 }
 0x59d   : > { %2123 = vmatpush.bf16.msra.mxu0 %v4449_v56  ;;  %v4475_v56 = vld [vmem:[%s5686_s3 + $0x1b8] sm:$0xff] }
 0x5a1   : > { %2124 = vmatpush.bf16.msra.mxu0 %v4448_v59  ;;  %v4467_v59 = vld [vmem:[%s5684_s1 + $0x1b8] sm:$0xff] }
 0x5ff   : > { %v1271_v26 = vpop.xlane.xlu1 %1270 }
 0x600   : > { %4611 = vrcp.f32 %v1271_v26 }
 0x606   : > { %v4612_v28 = vpop.eup %4611 }
 0x607   : > { %v1274_v27 = vpop.xlane.xlu2 %1273  ;;  %v1277_v30 = vmul.f32 %v4612_v28, %v4608_v7 }
 0x608   : > { %4613 = vrcp.f32 %v1274_v27 }
 0x60e   : > { %v4614_v29 = vpop.eup %4613 }
 0x60f   : > { %v1278_v31 = vmul.f32 %v4614_v29, %v4610_v10 }
 0x611   : > { %v1279_v33 = vpack.c.bf16 %v1278_v31, %v1277_v30  ;;  %v1802_v24 = vpop.f32.mrf.mxu0  ;;  %v1718_v37 = vpop.f32.mrf.mxu3 }
 0x612   : > { %v1803_v26 = vadd.f32 %v4578_v25, %v1802_v24  ;;  %v1719_v41 = vadd.f32 %v4579_v39, %v1718_v37 }
 0x613   : > { %3527 = vmatmul.msk.bf16.vlgmr.msra.gmra.mxu2 %vm588_vm0, %v1279_v33 }
 0x614   : > { %1619 = vmatpush.bf16.msra.mxu2 %v1608_v23 }
 0x619   : > { %v1804_v27 = vpop.f32.mrf.mxu0  ;;  %v1720_v40 = vpop.f32.mrf.mxu3 }
 0x61a   : > { %v1805_v28 = vadd.f32 %v4578_v25, %v1804_v27  ;;  %v1721_v43 = vadd.f32 %v4579_v39, %v1720_v40 }
 0x61c   : > { %v1892_v29 = vpack.c.bf16 %v1805_v28, %v1803_v26  ;;  %v1891_v44 = vpack.c.bf16 %v1721_v43, %v1719_v41 }
 0x61e   : > { %v1897_v30 = vsel %vm588_vm0, %v1892_v29, 0 }
 0x623   : > { %3675 = vmatmul.msk.bf16.vlgmr.msrb.gmra.mxu2 %vm588_vm0, %v1563_v38 }
 0x624   : > { %1906 = vmatpush.bf16.xpose.msrb.mxu2 %v1897_v30 }
 0x696   : > { %v5190_v46 = vpop.f32.mrf.mxu2 }
 0x69e   : > { %v5207_v53 = vpop.f32.mrf.mxu2 }
 0x6a6   : > { %v1580_v58 = vpop.f32.mrf.mxu2 }
 0x6a7   : > { %v1585_v60 = vsel %vm588_vm0, %v1580_v58, -inf }
 0x6a8   : > { %1586 = vmax.xlane.f32.xlu0 %v1585_v60 }
 0x6ae   : > { %v1582_v62 = vpop.f32.mrf.mxu2 }
 0x6af   : > { %v1588_v63 = vsel %vm588_vm0, %v1582_v62, -inf }
 0x6b0   : > { %1589 = vmax.xlane.f32.xlu1 %v1588_v63  ;;  %v4430_v63 = vld [vmem:[%s5688_s5 + $0x110] sm:$0xff] }
 0x71b   : > { %v1587_v7 = vpop.xlane.xlu0 %1586 }
 0x71c   : > { %v1591_v8 = vsub.f32 %v1580_v58, %v1587_v7  ;;  %v4432_v58 = vld [vmem:[%s5688_s5 + $0x120] sm:$0xff] }
 0x71d   : > { %1880 = vmatpush.bf16.msra.mxu1 %v4432_v58  ;;  %v4440_v7 = vld [vmem:[%s5684_s1 + $0x160] sm:$0xff]  ;;  %v4474_v58 = vld [vmem:[%s5686_s3 + $0x1b0] sm:$0xff] }
 0x71e   : > { %v1593_v9 = vmul.f32 1.442695, %v1591_v8  ;;  %2040 = vmatpush.bf16.msrb.mxu3 %v4440_v7  ;;  %v4439_v8 = vld [vmem:[%s5684_s1 + $0x158] sm:$0xff]  ;;  %v4454_v7 = vld [vmem:[%s5688_s5 + $0x150] sm:$0xff] }
 0x720   : > { %4615 = vpow2.f32 %v1593_v9  ;;  %v4438_v9 = vld [vmem:[%s5684_s1 + $0x150] sm:$0xff] }
 0x721   : > { %1881 = vmatpush.bf16.msra.mxu1 %v4431_v61  ;;  %v4466_v61 = vld [vmem:[%s5684_s1 + $0x1b0] sm:$0xff] }
 0x722   : > { %2041 = vmatpush.bf16.msrb.mxu3 %v4439_v8  ;;  %v4470_v8 = vld [vmem:[%s5686_s3 + $0x190] sm:$0xff] }
 0x723   : > { %v1590_v10 = vpop.xlane.xlu1 %1589 }
 0x724   : > { %v1592_v11 = vsub.f32 %v1582_v62, %v1590_v10  ;;  %v4447_v62 = vld [vmem:[%s5686_s3 + $0x158] sm:$0xff]  ;;  %v4445_v10 = vld [vmem:[%s5686_s3 + $0x148] sm:$0xff] }
 0x725   : > { %2125 = vmatpush.bf16.msra.mxu0 %v4447_v62  ;;  %1882 = vmatpush.bf16.msra.mxu1 %v4430_v63  ;;  %v4457_v63 = vld [vmem:[%s5688_s5 + $0x168] sm:$0xff] }
 0x726   : > { %v4616_v12 = vpop.eup %4615  ;;  %v1595_v13 = vmul.f32 1.442695, %v1592_v11  ;;  %2042 = vmatpush.bf16.msrb.mxu3 %v4438_v9  ;;  %v4437_v11 = vld [vmem:[%s5684_s1 + $0x148] sm:$0xff] }
 0x727   : > { %v1597_v14 = vsel %vm588_vm0, %v4616_v12, 0.0 }
 0x728   : > { %4617 = vpow2.f32 %v1595_v13  ;;  %1598 = vadd.xlane.f32.xlu2 %v1597_v14  ;;  %v4436_v13 = vld [vmem:[%s5684_s1 + $0x140] sm:$0xff] }
 0x729   : > { %2126 = vmatpush.bf16.msra.mxu0 %v4446_v0  ;;  %1883 = vmatpush.bf16.msra.mxu1 %v4429_v2  ;;  %v4473_v0 = vld [vmem:[%s5686_s3 + $0x1a8] sm:$0xff]  ;;  %v4456_v2 = vld [vmem:[%s5688_s5 + $0x160] sm:$0xff] }
 0x72a   : > { %2043 = vmatpush.bf16.msrb.mxu3 %v4437_v11 }
 0x72d   : > { %1884 = vmatpush.bf16.msra.mxu1 %v4428_v4  ;;  %2127 = vmatpush.bf16.msra.mxu0 %v4445_v10  ;;  %v4453_v10 = vld [vmem:[%s5688_s5 + $0x148] sm:$0xff] }
 0x72e   : > { %v4618_v15 = vpop.eup %4617  ;;  %2044 = vmatpush.bf16.msrb.mxu3 %v4436_v13 }
 0x72f   : > { %v1600_v18 = vsel %vm588_vm0, %v4618_v15, 0.0 }
 0x730   : > { %1601 = vadd.xlane.f32.xlu0 %v1600_v18  ;;  %1885 = vmatmul.bf16.vlgmr.msra.gmra.mxu1 %v4883_v16 }
 0x731   : > { %2045 = vmatmul.bf16.vlgmr.msrb.gmra.mxu3 %v4883_v16  ;;  %2205 = vmatpush.bf16.msrb.mxu1 %v4459_v55 }
 0x732   : > { %2365 = vmatpush.bf16.msra.mxu3 %v4467_v59  ;;  %v4585_v59 = vld [vmem:[%s5685_s2 + $0x6] ss:$0 sm:$0xff] }
 0x735   : > { %2206 = vmatpush.bf16.msrb.mxu1 %v4458_v57 }
 0x736   : > { %2366 = vmatpush.bf16.msra.mxu3 %v4466_v61 }
 0x739   : > { %2207 = vmatpush.bf16.msrb.mxu1 %v4457_v63 }
 0x73d   : > { %2208 = vmatpush.bf16.msrb.mxu1 %v4456_v2  ;;  %v4483_v2 = vld [vmem:[%s5688_s5 + $0x1b8] sm:$0xff] }
 0x79b   : > { %v1599_v31 = vpop.xlane.xlu2 %1598 }
 0x79c   : > { %4619 = vrcp.f32 %v1599_v31  ;;  %v4581_v31 = vld [vmem:[%s5687_s4 + $0x5] ss:$0 sm:$0xff] }
 0x7a2   : > { %v4620_v33 = vpop.eup %4619 }
 0x7a3   : > { %v1602_v32 = vpop.xlane.xlu0 %1601  ;;  %v1605_v35 = vmul.f32 %v4620_v33, %v4616_v12  ;;  %v4444_v12 = vld [vmem:[%s5686_s3 + $0x140] sm:$0xff] }
 0x7a4   : > { %4621 = vrcp.f32 %v1602_v32  ;;  %2128 = vmatpush.bf16.msra.mxu0 %v4444_v12  ;;  %v4452_v12 = vld [vmem:[%s5688_s5 + $0x140] sm:$0xff] }
 0x7a7   : > { %2129 = vmatmul.bf16.vlgmr.msra.gmra.mxu0 %v4883_v16  ;;  %v4580_v16 = vld [vmem:[%s5689_s6 + $0x4] ss:$0 sm:$0xff] }
 0x7a8   : > { %2449 = vmatpush.bf16.msrb.mxu0 %v4475_v56 }
 0x7aa   : > { %v4622_v34 = vpop.eup %4621 }
 0x7ab   : > { %v1606_v36 = vmul.f32 %v4622_v34, %v4618_v15 }
 0x7ac   : > { %2450 = vmatpush.bf16.msrb.mxu0 %v4474_v58 }
 0x7ad   : > { %v1607_v38 = vpack.c.bf16 %v1606_v36, %v1605_v35  ;;  %v1886_v24 = vpop.f32.mrf.mxu1 }
 0x7ae   : > { %v1887_v26 = vadd.f32 %v4580_v16, %v1886_v24 }
 0x7af   : > { %3676 = vmatmul.msk.bf16.vlgmr.msra.gmra.mxu2 %vm588_vm0, %v1607_v38 }
 0x7b0   : > { %2451 = vmatpush.bf16.msrb.mxu0 %v4473_v0 }
 0x7b5   : > { %v1888_v27 = vpop.f32.mrf.mxu1 }
 0x7b6   : > { %v1889_v28 = vadd.f32 %v4580_v16, %v1888_v27 }
 0x7b8   : > { %v1936_v29 = vpack.c.bf16 %v1889_v28, %v1887_v26 }
 0x7ba   : > { %1947 = vmatpush.bf16.msra.mxu2 %v1936_v29 }
 0x7bf   : > { %3824 = vmatmul.msk.bf16.vlgmr.msrb.gmra.mxu2 %vm588_vm0, %v1891_v44  ;;  %v2046_v44 = vpop.f32.mrf.mxu3 }
 0x7c0   : > { %v2047_v50 = vadd.f32 %v4582_v47, %v2046_v44 }
 0x7c7   : > { %v2048_v49 = vpop.f32.mrf.mxu3 }
 0x7c8   : > { %v2049_v51 = vadd.f32 %v4582_v47, %v2048_v49 }
 0x7ca   : > { %v2219_v52 = vpack.c.bf16 %v2049_v51, %v2047_v50 }
 0x824   : > { %v2130_v30 = vpop.f32.mrf.mxu0 }
 0x825   : > { %v2131_v32 = vadd.f32 %v4581_v31, %v2130_v30 }
 0x82c   : > { %v2132_v33 = vpop.f32.mrf.mxu0 }
 0x82d   : > { %v2133_v34 = vadd.f32 %v4581_v31, %v2132_v33 }
 0x82f   : > { %v2220_v35 = vpack.c.bf16 %v2133_v34, %v2131_v32  ;;  %v4583_v34 = vld [vmem:[%s5689_s6 + $0x5] ss:$0 sm:$0xff] }
 0x831   : > { %v2225_v36 = vsel %vm588_vm0, %v2220_v35, 0 }
 0x832   : > { %v5285_v54 = vpop.f32.mrf.mxu2  ;;  %2234 = vmatpush.bf16.xpose.msrb.mxu2 %v2225_v36 }
 0x83a   : > { %v5302_v60 = vpop.f32.mrf.mxu2 }
 0x842   : > { %v1908_v1 = vpop.f32.mrf.mxu2 }
 0x843   : > { %v1913_v3 = vsel %vm588_vm0, %v1908_v1, -inf }
 0x844   : > { %1914 = vmax.xlane.f32.xlu1 %v1913_v3  ;;  %v4472_v3 = vld [vmem:[%s5686_s3 + $0x1a0] sm:$0xff] }
 0x845   : > { %2452 = vmatpush.bf16.msrb.mxu0 %v4472_v3  ;;  %v4499_v3 = vld [vmem:[%s5686_s3 + $0x1f8] sm:$0xff] }
 0x84a   : > { %v1910_v5 = vpop.f32.mrf.mxu2 }
 0x84b   : > { %v1916_v6 = vsel %vm588_vm0, %v1910_v5, -inf }
 0x84c   : > { %1917 = vmax.xlane.f32.xlu2 %v1916_v6  ;;  %v4471_v6 = vld [vmem:[%s5686_s3 + $0x198] sm:$0xff] }
 0x84d   : > { %2453 = vmatpush.bf16.msrb.mxu0 %v4471_v6  ;;  %v4498_v6 = vld [vmem:[%s5686_s3 + $0x1f0] sm:$0xff] }
 0x851   : > { %2454 = vmatpush.bf16.msrb.mxu0 %v4470_v8  ;;  %v4490_v8 = vld [vmem:[%s5684_s1 + $0x1f0] sm:$0xff] }
 0x8b7   : > { %v1915_v14 = vpop.xlane.xlu1 %1914 }
 0x8b8   : > { %v1919_v15 = vsub.f32 %v1908_v1, %v1915_v14  ;;  %v4465_v1 = vld [vmem:[%s5684_s1 + $0x1a8] sm:$0xff] }
 0x8b9   : > { %2367 = vmatpush.bf16.msra.mxu3 %v4465_v1 }
 0x8ba   : > { %v1921_v17 = vmul.f32 1.442695, %v1919_v15  ;;  %v5420_v15 = vld [vmem:[%s4877_s16] sm:$0xff]  ;;  %s4723_s16 = smov 80  }
 0x8bc   : > { %4623 = vpow2.f32 %v1921_v17  ;;  %v4464_v17 = vld [vmem:[%s5684_s1 + $0x1a0] sm:$0xff] }
 0x8bd   : > { %2368 = vmatpush.bf16.msra.mxu3 %v4464_v17 }
 0x8bf   : > { %v1918_v18 = vpop.xlane.xlu2 %1917 }
 0x8c0   : > { %v1920_v19 = vsub.f32 %v1910_v5, %v1918_v18  ;;  %v4455_v5 = vld [vmem:[%s5688_s5 + $0x158] sm:$0xff] }
 0x8c1   : > { %2209 = vmatpush.bf16.msrb.mxu1 %v4455_v5  ;;  %v4463_v18 = vld [vmem:[%s5684_s1 + $0x198] sm:$0xff]  ;;  %v4482_v5 = vld [vmem:[%s5688_s5 + $0x1b0] sm:$0xff] }
 0x8c2   : > { %v4624_v20 = vpop.eup %4623  ;;  %v1923_v21 = vmul.f32 1.442695, %v1920_v19  ;;  %2369 = vmatpush.bf16.msra.mxu3 %v4463_v18  ;;  %v4462_v19 = vld [vmem:[%s5684_s1 + $0x190] sm:$0xff]  ;;  %v4479_v18 = vld [vmem:[%s5688_s5 + $0x198] sm:$0xff] }
 0x8c3   : > { %v1925_v22 = vsel %vm588_vm0, %v4624_v20, 0.0 }
 0x8c4   : > { %4625 = vpow2.f32 %v1923_v21  ;;  %1926 = vadd.xlane.f32.xlu0 %v1925_v22  ;;  %v4461_v21 = vld [vmem:[%s5684_s1 + $0x188] sm:$0xff]  ;;  %v4468_v22 = vld [vmem:[%s5686_s3 + $0x180] sm:$0xff] }
 0x8c5   : > { %2210 = vmatpush.bf16.msrb.mxu1 %v4454_v7  ;;  %v4491_v7 = vld [vmem:[%s5684_s1 + $0x1f8] sm:$0xff] }
 0x8c6   : > { %2370 = vmatpush.bf16.msra.mxu3 %v4462_v19  ;;  %v4495_v19 = vld [vmem:[%s5686_s3 + $0x1d8] sm:$0xff] }
 0x8c9   : > { %2211 = vmatpush.bf16.msrb.mxu1 %v4453_v10  ;;  %v4481_v10 = vld [vmem:[%s5688_s5 + $0x1a8] sm:$0xff] }
 0x8ca   : > { %v4626_v23 = vpop.eup %4625  ;;  %2371 = vmatpush.bf16.msra.mxu3 %v4461_v21  ;;  %v4494_v21 = vld [vmem:[%s5686_s3 + $0x1d0] sm:$0xff] }
 0x8cb   : > { %v1928_v25 = vsel %vm588_vm0, %v4626_v23, 0.0 }
 0x8cc   : > { %1929 = vadd.xlane.f32.xlu1 %v1928_v25 }
 0x8cd   : > { %2212 = vmatpush.bf16.msrb.mxu1 %v4452_v12  ;;  %v4489_v12 = vld [vmem:[%s5684_s1 + $0x1e8] sm:$0xff] }
 0x8d0   : > { %2213 = vmatmul.bf16.vlgmr.msrb.gmra.mxu1 %v5420_v15 }
 0x8d1   : > { %2533 = vmatpush.bf16.msra.mxu1 %v4483_v2 }
 0x8d5   : > { %2534 = vmatpush.bf16.msra.mxu1 %v4482_v5 }
 0x8d9   : > { %2535 = vmatpush.bf16.msra.mxu1 %v4481_v10  ;;  %v4588_v10 = vld [vmem:[%s5685_s2 + $0x7] ss:$0 sm:$0xff] }
 0x937   : > { %v1927_v37 = vpop.xlane.xlu0 %1926 }
 0x938   : > { %4627 = vrcp.f32 %v1927_v37 }
 0x93e   : > { %v4628_v39 = vpop.eup %4627 }
 0x93f   : > { %v1930_v38 = vpop.xlane.xlu1 %1929  ;;  %v1933_v41 = vmul.f32 %v4628_v39, %v4624_v20  ;;  %v4469_v20 = vld [vmem:[%s5686_s3 + $0x188] sm:$0xff] }
 0x940   : > { %4629 = vrcp.f32 %v1930_v38  ;;  %2455 = vmatpush.bf16.msrb.mxu0 %v4469_v20  ;;  %v4478_v20 = vld [vmem:[%s5688_s5 + $0x190] sm:$0xff] }
 0x944   : > { %2456 = vmatpush.bf16.msrb.mxu0 %v4468_v22 }
 0x946   : > { %v4630_v40 = vpop.eup %4629 }
 0x947   : > { %v1934_v43 = vmul.f32 %v4630_v40, %v4626_v23  ;;  %v4460_v23 = vld [vmem:[%s5684_s1 + $0x180] sm:$0xff]  ;;  %2457 = vmatmul.bf16.vlgmr.msrb.gmra.mxu0 %v5420_v15 }
 0x948   : > { %2372 = vmatpush.bf16.msra.mxu3 %v4460_v23  ;;  %v4584_v40 = vld [vmem:[%s5687_s4 + $0x6] ss:$0 sm:$0xff]  ;;  %2777 = vmatpush.bf16.msra.mxu0 %v4499_v3  ;;  %v4477_v23 = vld [vmem:[%s5688_s5 + $0x188] sm:$0xff] }
 0x949   : > { %v1935_v45 = vpack.c.bf16 %v1934_v43, %v1933_v41 }
 0x94b   : > { %3825 = vmatmul.msk.bf16.vlgmr.msra.gmra.mxu2 %vm588_vm0, %v1935_v45  ;;  %2373 = vmatmul.bf16.vlgmr.msra.gmra.mxu3 %v5420_v15 }
 0x94c   : > { %2693 = vmatpush.bf16.msrb.mxu3 %v4491_v7  ;;  %2778 = vmatpush.bf16.msra.mxu0 %v4498_v6 }
 0x94d   : > { %v2214_v32 = vpop.f32.mrf.mxu1 }
 0x94e   : > { %v2215_v35 = vadd.f32 %v4583_v34, %v2214_v32  ;;  %v4492_v32 = vld [vmem:[%s5686_s3 + $0x1c0] sm:$0xff] }
 0x950   : > { %2694 = vmatpush.bf16.msrb.mxu3 %v4490_v8 }
 0x954   : > { %2695 = vmatpush.bf16.msrb.mxu3 %v4489_v12 }
 0x955   : > { %v2216_v36 = vpop.f32.mrf.mxu1 }
 0x956   : > { %v2217_v37 = vadd.f32 %v4583_v34, %v2216_v36 }
 0x958   : > { %v2264_v38 = vpack.c.bf16 %v2217_v37, %v2215_v35 }
 0x95a   : > { %2275 = vmatpush.bf16.msra.mxu2 %v2264_v38 }
 0x95b   : > { %3973 = vmatmul.msk.bf16.vlgmr.msrb.gmra.mxu2 %vm588_vm0, %v2219_v52 }
 0x9c4   : > { %v2458_v39 = vpop.f32.mrf.mxu0 }
 0x9c5   : > { %v2459_v41 = vadd.f32 %v4584_v40, %v2458_v39 }
 0x9cc   : > { %v2460_v43 = vpop.f32.mrf.mxu0 }
 0x9cd   : > { %v2461_v44 = vadd.f32 %v4584_v40, %v2460_v43 }
 0x9ce   : > { %v5380_v62 = vpop.f32.mrf.mxu2  ;;  %v2374_v57 = vpop.f32.mrf.mxu3 }
 0x9cf   : > { %v2548_v45 = vpack.c.bf16 %v2461_v44, %v2459_v41  ;;  %v2375_v63 = vadd.f32 %v4585_v59, %v2374_v57 }
 0x9d1   : > { %v2553_v47 = vsel %vm588_vm0, %v2548_v45, 0 }
 0x9d2   : > { %2562 = vmatpush.bf16.xpose.msrb.mxu2 %v2553_v47  ;;  %v4586_v47 = vld [vmem:[%s5689_s6 + $0x6] ss:$0 sm:$0xff] }
 0x9d6   : > { %v5397_v4 = vpop.f32.mrf.mxu2  ;;  %v2376_v61 = vpop.f32.mrf.mxu3 }
 0x9d7   : > { %v2377_v0 = vadd.f32 %v4585_v59, %v2376_v61 }
 0x9d9   : > { %v2547_v1 = vpack.c.bf16 %v2377_v0, %v2375_v63 }
 0x9de   : > { %v2236_v9 = vpop.f32.mrf.mxu2 }
 0x9df   : > { %v2241_v11 = vsel %vm588_vm0, %v2236_v9, -inf }
 0x9e0   : > { %2242 = vmax.xlane.f32.xlu2 %v2241_v11  ;;  %v4497_v11 = vld [vmem:[%s5686_s3 + $0x1e8] sm:$0xff] }
 0x9e1   : > { %2779 = vmatpush.bf16.msra.mxu0 %v4497_v11 }
 0x9e6   : > { %v2238_v13 = vpop.f32.mrf.mxu2 }
 0x9e7   : > { %v2244_v14 = vsel %vm588_vm0, %v2238_v13, -inf }
 0x9e8   : > { %2245 = vmax.xlane.f32.xlu0 %v2244_v14  ;;  %v4496_v14 = vld [vmem:[%s5686_s3 + $0x1e0] sm:$0xff] }
 0x9e9   : > { %2780 = vmatpush.bf16.msra.mxu0 %v4496_v14 }
 0x9ed   : > { %2781 = vmatpush.bf16.msra.mxu0 %v4495_v19 }
 0x9f1   : > { %2782 = vmatpush.bf16.msra.mxu0 %v4494_v21 }
 0xa53   : > { %v2243_v24 = vpop.xlane.xlu2 %2242 }
 0xa54   : > { %v2247_v25 = vsub.f32 %v2236_v9, %v2243_v24 }
 0xa56   : > { %v2249_v16 = vmul.f32 1.442695, %v2247_v25  ;;  %v4476_v25 = vld [vmem:[%s5688_s5 + $0x180] sm:$0xff] }
 0xa58   : > { %4631 = vpow2.f32 %v2249_v16 }
 0xa5b   : > { %v2246_v26 = vpop.xlane.xlu0 %2245 }
 0xa5c   : > { %v2248_v27 = vsub.f32 %v2238_v13, %v2246_v26  ;;  %v4480_v13 = vld [vmem:[%s5688_s5 + $0x1a0] sm:$0xff] }
 0xa5d   : > { %2536 = vmatpush.bf16.msra.mxu1 %v4480_v13 }
 0xa5e   : > { %v4632_v28 = vpop.eup %4631  ;;  %v2251_v29 = vmul.f32 1.442695, %v2248_v27  ;;  %v4488_v27 = vld [vmem:[%s5684_s1 + $0x1e0] sm:$0xff] }
 0xa5f   : > { %v2253_v30 = vsel %vm588_vm0, %v4632_v28, 0.0  ;;  %2696 = vmatpush.bf16.msrb.mxu3 %v4488_v27  ;;  %v4504_v27 = vld [vmem:[%s5688_s5 + $0x1e0] sm:$0xff] }
 0xa60   : > { %4633 = vpow2.f32 %v2251_v29  ;;  %2254 = vadd.xlane.f32.xlu1 %v2253_v30  ;;  %v4486_v29 = vld [vmem:[%s5684_s1 + $0x1d0] sm:$0xff]  ;;  %v4493_v30 = vld [vmem:[%s5686_s3 + $0x1c8] sm:$0xff] }
 0xa61   : > { %2537 = vmatpush.bf16.msra.mxu1 %v4479_v18  ;;  %2783 = vmatpush.bf16.msra.mxu0 %v4493_v30 }
 0xa65   : > { %2538 = vmatpush.bf16.msra.mxu1 %v4478_v20  ;;  %2784 = vmatpush.bf16.msra.mxu0 %v4492_v32 }
 0xa66   : > { %v4634_v31 = vpop.eup %4633 }
 0xa67   : > { %v2256_v33 = vsel %vm588_vm0, %v4634_v31, 0.0 }
 0xa68   : > { %2257 = vadd.xlane.f32.xlu2 %v2256_v33  ;;  %v4484_v33 = vld [vmem:[%s5684_s1 + $0x1c0] sm:$0xff]  ;;  %2785 = vmatmul.bf16.vlgmr.msra.gmra.mxu0 %v5420_v15 }
 0xa69   : > { %2539 = vmatpush.bf16.msra.mxu1 %v4477_v23 }
 0xa6d   : > { %2540 = vmatpush.bf16.msra.mxu1 %v4476_v25  ;;  %v4507_v25 = vld [vmem:[%s5688_s5 + $0x1f8] sm:$0xff] }
 0xa70   : > { %2541 = vmatmul.bf16.vlgmr.msra.gmra.mxu1 %v5420_v15 }
 0xa71   : > { %2861 = vmatpush.bf16.msrb.mxu1 %v4507_v25  ;;  %v4510_v25 = vld [vmem:[%s5690_s7 + $0x8] sm:$0xff] }
 0xad3   : > { %v2255_v49 = vpop.xlane.xlu1 %2254 }
 0xad4   : > { %4635 = vrcp.f32 %v2255_v49 }
 0xada   : > { %v4636_v51 = vpop.eup %4635 }
 0xadb   : > { %v2258_v50 = vpop.xlane.xlu2 %2257  ;;  %v2261_v55 = vmul.f32 %v4636_v51, %v4632_v28  ;;  %v4487_v28 = vld [vmem:[%s5684_s1 + $0x1d8] sm:$0xff] }
 0xadc   : > { %4637 = vrcp.f32 %v2258_v50  ;;  %2697 = vmatpush.bf16.msrb.mxu3 %v4487_v28  ;;  %v1627_v28 = vpack.c.bf16 %v5302_v60, %v5302_v60  ;;  %v4501_v60 = vld [vmem:[%s5688_s5 + $0x1c8] sm:$0xff] }
 0xae0   : > { %2698 = vmatpush.bf16.msrb.mxu3 %v4486_v29  ;;  %v4502_v29 = vld [vmem:[%s5688_s5 + $0x1d0] sm:$0xff] }
 0xae2   : > { %v4638_v52 = vpop.eup %4637 }
 0xae3   : > { %v2262_v56 = vmul.f32 %v4638_v52, %v4634_v31  ;;  %v4485_v31 = vld [vmem:[%s5684_s1 + $0x1c8] sm:$0xff] }
 0xae4   : > { %2699 = vmatpush.bf16.msrb.mxu3 %v4485_v31  ;;  %v4500_v31 = vld [vmem:[%s5688_s5 + $0x1c0] sm:$0xff] }
 0xae5   : > { %v2263_v58 = vpack.c.bf16 %v2262_v56, %v2261_v55  ;;  %v2786_v55 = vpop.f32.mrf.mxu0  ;;  %v4587_v56 = vld [vmem:[%s5687_s4 + $0x7] ss:$0 sm:$0xff] }
 0xae6   : > { %v2787_v57 = vadd.f32 %v4587_v56, %v2786_v55 }
 0xae7   : > { %3974 = vmatmul.msk.bf16.vlgmr.msra.gmra.mxu2 %vm588_vm0, %v2263_v58 }
 0xae8   : > { %2700 = vmatpush.bf16.msrb.mxu3 %v4484_v33 }
 0xaeb   : > { %2701 = vmatmul.bf16.vlgmr.msrb.gmra.mxu3 %v5420_v15 }
 0xaed   : > { %v2542_v44 = vpop.f32.mrf.mxu1  ;;  %v2788_v58 = vpop.f32.mrf.mxu0 }
 0xaee   : > { %v2543_v49 = vadd.f32 %v4586_v47, %v2542_v44  ;;  %v2789_v59 = vadd.f32 %v4587_v56, %v2788_v58  ;;  %v1626_v44 = vpack.c.bf16 %v5285_v54, %v5285_v54 }
 0xaf0   : > { %v2876_v61 = vpack.c.bf16 %v2789_v59, %v2787_v57 }
 0xaf2   : > { %v2881_v63 = vsel %vm588_vm0, %v2876_v61, 0 }
 0xaf5   : > { %v2544_v50 = vpop.f32.mrf.mxu1 }
 0xaf6   : > { %v2545_v51 = vadd.f32 %v4586_v47, %v2544_v50  ;;  %v1955_v47 = vpack.c.bf16 %v5397_v4, %v5397_v4  ;;  %v4589_v4 = vld [vmem:[%s5689_s6 + $0x7] ss:$0 sm:$0xff] }
 0xaf7   : > { %4122 = vmatmul.msk.bf16.vlgmr.msrb.gmra.mxu2 %vm588_vm0, %v2547_v1 }
 0xaf8   : > { %v2592_v52 = vpack.c.bf16 %v2545_v51, %v2543_v49 }
 0xafa   : > { %2603 = vmatpush.bf16.msra.mxu2 %v2592_v52 }
 0xafe   : > { %2890 = vmatpush.bf16.xpose.msrb.mxu2 %v2881_v63 }
 0xb6a   : > { %v5478_v9 = vpop.f32.mrf.mxu2 }
 0xb6b   : > { %v2282_v30 = vpack.c.bf16 %v5478_v9, %v5478_v9 }
 0xb6e   : > { %v2702_v7 = vpop.f32.mrf.mxu3 }
 0xb6f   : > { %v2703_v12 = vadd.f32 %v4588_v10, %v2702_v7 }
 0xb72   : > { %v5495_v17 = vpop.f32.mrf.mxu2 }
 0xb73   : > { %v2283_v54 = vpack.c.bf16 %v5495_v17, %v5495_v17 }
 0xb76   : > { %v2704_v11 = vpop.f32.mrf.mxu3 }
 0xb77   : > { %v2705_v13 = vadd.f32 %v4588_v10, %v2704_v11 }
 0xb79   : > { %v2875_v14 = vpack.c.bf16 %v2705_v13, %v2703_v12  ;;  %v4516_v12 = vld [vmem:[%s5690_s7 + $0x38] sm:$0xff]  ;;  %v4515_v13 = vld [vmem:[%s5690_s7 + $0x30] sm:$0xff] }
 0xb7a   : > { %v2564_v22 = vpop.f32.mrf.mxu2  ;;  %3027 = vmatpush.bf16.msra.mxu3 %v4516_v12 }
 0xb7b   : > { %v2569_v24 = vsel %vm588_vm0, %v2564_v22, -inf }
 0xb7c   : > { %2570 = vmax.xlane.f32.xlu0 %v2569_v24  ;;  %v970_v24 = vpack.c.bf16 %v5095_v42, %v5095_v42  ;;  %v4505_v42 = vld [vmem:[%s5688_s5 + $0x1e8] sm:$0xff] }
 0xb7e   : > { %3028 = vmatpush.bf16.msra.mxu3 %v4515_v13 }
 0xb82   : > { %v2566_v16 = vpop.f32.mrf.mxu2 }
 0xb83   : > { %v2572_v26 = vsel %vm588_vm0, %v2566_v16, -inf }
 0xb84   : > { %2573 = vmax.xlane.f32.xlu1 %v2572_v26  ;;  %v1299_v26 = vpack.c.bf16 %v5207_v53, %v5207_v53  ;;  %v4503_v53 = vld [vmem:[%s5688_s5 + $0x1d8] sm:$0xff] }
 0xbef   : > { %v2571_v34 = vpop.xlane.xlu0 %2570 }
 0xbf0   : > { %v2575_v35 = vsub.f32 %v2564_v22, %v2571_v34 }
 0xbf2   : > { %v2577_v36 = vmul.f32 1.442695, %v2575_v35 }
 0xbf4   : > { %4639 = vpow2.f32 %v2577_v36 }
 0xbf7   : > { %v2574_v37 = vpop.xlane.xlu1 %2573 }
 0xbf8   : > { %v2576_v38 = vsub.f32 %v2566_v16, %v2574_v37  ;;  %v4506_v16 = vld [vmem:[%s5688_s5 + $0x1f0] sm:$0xff] }
 0xbf9   : > { %2862 = vmatpush.bf16.msrb.mxu1 %v4506_v16  ;;  %v4509_v16 = vld [vmem:[%s5690_s7] sm:$0xff] }
 0xbfa   : > { %v4640_v39 = vpop.eup %4639  ;;  %v2579_v40 = vmul.f32 1.442695, %v2576_v38 }
 0xbfb   : > { %v2581_v41 = vsel %vm588_vm0, %v4640_v39, 0.0 }
 0xbfc   : > { %4641 = vpow2.f32 %v2579_v40  ;;  %2582 = vadd.xlane.f32.xlu2 %v2581_v41 }
 0xbfd   : > { %2863 = vmatpush.bf16.msrb.mxu1 %v4505_v42 }
 0xc01   : > { %2864 = vmatpush.bf16.msrb.mxu1 %v4504_v27 }
 0xc02   : > { %v4642_v43 = vpop.eup %4641 }
 0xc03   : > { %v2584_v45 = vsel %vm588_vm0, %v4642_v43, 0.0 }
 0xc04   : > { %2585 = vadd.xlane.f32.xlu0 %v2584_v45  ;;  %v1298_v45 = vpack.c.bf16 %v5190_v46, %v5190_v46 }
 0xc05   : > { %2865 = vmatpush.bf16.msrb.mxu1 %v4503_v53 }
 0xc09   : > { %2866 = vmatpush.bf16.msrb.mxu1 %v4502_v29 }
 0xc0d   : > { %2867 = vmatpush.bf16.msrb.mxu1 %v4501_v60 }
 0xc11   : > { %2868 = vmatpush.bf16.msrb.mxu1 %v4500_v31 }
 0xc14   : > { %2869 = vmatmul.bf16.vlgmr.msrb.gmra.mxu1 %v5420_v15  ;;  %v971_v15 = vpack.c.bf16 %v5112_v48, %v5112_v48  ;;  %v1954_v48 = vpack.c.bf16 %v5380_v62, %v5380_v62 }
 0xc6f   : > { %v2583_v0 = vpop.xlane.xlu2 %2582 }
 0xc70   : > { %4643 = vrcp.f32 %v2583_v0 }
 0xc76   : > { %v4644_v2 = vpop.eup %4643 }
 0xc77   : > { %v2586_v1 = vpop.xlane.xlu0 %2585  ;;  %v2589_v5 = vmul.f32 %v4644_v2, %v4640_v39 }
 0xc78   : > { %4645 = vrcp.f32 %v2586_v1 }
 0xc7e   : > { %v4646_v3 = vpop.eup %4645 }
 0xc7f   : > { %v2590_v6 = vmul.f32 %v4646_v3, %v4642_v43 }
 0xc81   : > { %v2591_v8 = vpack.c.bf16 %v2590_v6, %v2589_v5 }
 0xc83   : > { %4123 = vmatmul.msk.bf16.vlgmr.msra.gmra.mxu2 %vm588_vm0, %v2591_v8 }
 0xc91   : > { %v2870_v46 = vpop.f32.mrf.mxu1 }
 0xc92   : > { %v2871_v50 = vadd.f32 %v4589_v4, %v2870_v46 }
 0xc93   : > { %4271 = vmatmul.msk.bf16.vlgmr.msrb.gmra.mxu2 %vm588_vm0, %v2875_v14  ;;  %v4514_v14 = vld [vmem:[%s5690_s7 + $0x28] sm:$0xff] }
 0xc94   : > { %3029 = vmatpush.bf16.msra.mxu3 %v4514_v14 }
 0xc99   : > { %v2872_v51 = vpop.f32.mrf.mxu1 }
 0xc9a   : > { %v2873_v52 = vadd.f32 %v4589_v4, %v2872_v51 }
 0xc9c   : > { %v2920_v62 = vpack.c.bf16 %v2873_v52, %v2871_v50 }
 0xc9e   : > { %2931 = vmatpush.bf16.msra.mxu2 %v2920_v62 }
 0xd06   : > { %v5555_v18 = vpop.f32.mrf.mxu2 }
 0xd07   : > { %v2610_v49 = vpack.c.bf16 %v5555_v18, %v5555_v18  ;;  %v4513_v18 = vld [vmem:[%s5690_s7 + $0x20] sm:$0xff] }
 0xd08   : > { %3030 = vmatpush.bf16.msra.mxu3 %v4513_v18 }
 0xd0e   : > { %v2607_v19 = vpop.f32.mrf.mxu2 }
 0xd0f   : > { %v2611_v32 = vpack.c.bf16 %v2607_v19, %v2607_v19 }
 0xd16   : > { %v2892_v20 = vpop.f32.mrf.mxu2 }
 0xd17   : > { %v2897_v21 = vsel %vm588_vm0, %v2892_v20, -inf }
 0xd18   : > { %2898 = vmax.xlane.f32.xlu1 %v2897_v21 }
 0xd1e   : > { %v2894_v22 = vpop.f32.mrf.mxu2 }
 0xd1f   : > { %v2900_v23 = vsel %vm588_vm0, %v2894_v22, -inf }
 0xd20   : > { %2901 = vmax.xlane.f32.xlu2 %v2900_v23  ;;  %v4512_v23 = vld [vmem:[%s5690_s7 + $0x18] sm:$0xff] }
 0xd21   : > { %3031 = vmatpush.bf16.msra.mxu3 %v4512_v23 }
 0xd38   : > { %974 = vrot.lane.b32.xlu2 %v970_v24, %s4720_s24  ;;  %v4511_v24 = vld [vmem:[%s5690_s7 + $0x10] sm:$0xff] }
 0xd39   : > { %3032 = vmatpush.bf16.msra.mxu3 %v4511_v24 }
 0xd3d   : > { %3033 = vmatpush.bf16.msra.mxu3 %v4510_v25 }
 0xd40   : > { %1304 = vrot.lane.b32.xlu2 %v1299_v26, %s4721_s14 }
 0xd41   : > { %3034 = vmatpush.bf16.msra.mxu3 %v4509_v16 }
 0xd48   : > { %1632 = vrot.lane.b32.xlu2 %v1627_v28, %s4722_s25  ;;  %v4590_v28 = vld [vmem:[%s5691_s8] ss:$0 sm:$0xff] }
 0xd50   : > { %2286 = vrot.lane.b32.xlu2 %v2282_v30, %s4723_s16 }
 0xd58   : > { %2616 = vrot.lane.b32.xlu2 %v2611_v32, %s4724_s21 }
 0xd8b   : > { %v2899_v9 = vpop.xlane.xlu1 %2898 }
 0xd8c   : > { %v2903_v33 = vsub.f32 %v2892_v20, %v2899_v9 }
 0xd8e   : > { %v2905_v34 = vmul.f32 1.442695, %v2903_v33 }
 0xd90   : > { %4647 = vpow2.f32 %v2905_v34 }
 0xd93   : > { %v2902_v35 = vpop.xlane.xlu2 %2901 }
 0xd94   : > { %v2904_v36 = vsub.f32 %v2894_v22, %v2902_v35 }
 0xd96   : > { %v4648_v37 = vpop.eup %4647  ;;  %v2907_v38 = vmul.f32 1.442695, %v2904_v36 }
 0xd97   : > { %v2909_v39 = vsel %vm588_vm0, %v4648_v37, 0.0 }
 0xd98   : > { %4649 = vpow2.f32 %v2907_v38  ;;  %2910 = vadd.xlane.f32.xlu0 %v2909_v39 }
 0xd9b   : > { %v975_v40 = vpop.permute.xlu2 %974 }
 0xd9c   : > { %981 = vst.msk [vmem:[#allocation2] sm:$0xf] %vm980_vm2, %v975_v40 }
 0xd9e   : > { %v4650_v41 = vpop.eup %4649 }
 0xd9f   : > { %v2912_v43 = vsel %vm588_vm0, %v4650_v41, 0.0 }
 0xda0   : > { %2913 = vadd.xlane.f32.xlu1 %v2912_v43 }
 0xda3   : > { %v1305_v57 = vpop.permute.xlu2 %1304 }
 0xdab   : > { %v1633_v1 = vpop.permute.xlu2 %1632 }
 0xdac   : > { %976 = vrot.lane.b32.xlu0 %v971_v15, %s4720_s24 }
 0xdb3   : > { %v2287_v6 = vpop.permute.xlu2 %2286 }
 0xdb4   : > { %1630 = vrot.lane.b32.xlu0 %v1626_v44, %s4722_s25 }
 0xdb9   : > { %1302 = vrot.lane.b32.xlu1 %v1298_v45, %s4721_s14 }
 0xdbb   : > { %v2617_v11 = vpop.permute.xlu2 %2616 }
 0xdbc   : > { %1960 = vrot.lane.b32.xlu0 %v1955_v47, %s4725_s23 }
 0xdc1   : > { %1958 = vrot.lane.b32.xlu1 %v1954_v48, %s4725_s23  ;;  %s4517_s23 = sshll.u32 %s4800_s13, 4 }
 0xdc2   : > { %s3055_s25 = scalar_lea.hbm %s5692_s9, %s4517_s23 }
 0xdc3   : > { %s3058_s28 = sshll.u32 %s3055_s25, 4  ;;  %s3059_s28 = int_to_ptr.hbm [resolvable:$true] %s3058_s28 }
 0xdc4   : > { %2614 = vrot.lane.b32.xlu0 %v2610_v49, %s4724_s21  ;;  %s4726_s21 = smov 112   ;;  %s4670_s22 = sshra.s32 %s3059_s28, 4  ;;  %s4671_s22 = int_to_ptr.hbm [resolvable:$true] %s4670_s22 }
 0xdc5   : > { %s4672_s13 = scalar_lea.hbm %s4671_s22, 16  ;;  %p4677_p0 = scmp.lt.s32.totalorder %s4671_s22, %s5692_s9 }
 0xdc6   : > { %p4673_p11 = scmp.ne.s32.totalorder %s4671_s22, %s4672_s13 }
 0xdc8   : > { %p4674_p12 = pnand %p4673_p11, %p4817_p5 }
 0xdc9   : > { %2288 = vrot.lane.b32.xlu1 %v2283_v54, %s4723_s16  ;;  %s323_s16 = sand.u32 1, %s4710_s10  }
 0xdca   : > { %s3125_s17 = sshll.u32 %s323_s16, 4  ;;  %s3044_s29 = scalar_lea.sflag [#allocation4], %s323_s16 }
 0xdcb   : > { %s325_s26 = scalar_lea.vmem [#allocation3], %s3125_s17  ;;  %p4675_p13 = pneg %p4674_p12 }
 0xdcc   : > { %s3056_s27 = sshll.u32 %s325_s26, 4  ;;  %s4676_s17 = scalar_lea.hbm %s5692_s9, 32  ;;  %s3057_s27 = int_to_ptr.vmem [resolvable:$true] %s3056_s27 }
 0xdcd   : > { %p4678_p1 = scmp.lt.s32.totalorder %s4676_s17, %s4672_s13 }
 0xdcf   : > { %p4679_p2 = por %p4678_p1, %p4677_p0 }
 0xdd1   : > { %p4680_p3 = pnand %p4679_p2, %p4675_p13 }
 0xe0b   : > { %v2911_v55 = vpop.xlane.xlu0 %2910 }
 0xe0c   : > { %4651 = vrcp.f32 %v2911_v55 }
 0xe12   : > { %v4652_v58 = vpop.eup %4651 }
 0xe13   : > { %v2914_v56 = vpop.xlane.xlu1 %2913  ;;  %v2917_v17 = vmul.f32 %v4652_v58, %v4648_v37 }
 0xe14   : > { %4653 = vrcp.f32 %v2914_v56 }
 0xe1a   : > { %v4654_v59 = vpop.eup %4653 }
 0xe1b   : > { %v2918_v61 = vmul.f32 %v4654_v59, %v4650_v41 }
 0xe1d   : > { %v2919_v63 = vpack.c.bf16 %v2918_v61, %v2917_v17 }
 0xe1e   : > { %v977_v0 = vpop.permute.xlu0 %976 }
 0xe1f   : > { %982 = vst.msk [vmem:[#allocation2 + $0x4] sm:$0xf] %vm980_vm2, %v977_v0  ;;  %4272 = vmatmul.msk.bf16.vlgmr.msra.gmra.mxu2 %vm588_vm0, %v2919_v63 }
 0xe20   : > { %1310 = vst.msk [vmem:[#allocation2 + $0x4] sm:$0xf] %vm1308_vm3, %v1305_v57 }
 0xe21   : > { %1638 = vst.msk [vmem:[#allocation2 + $0x4] sm:$0xf] %vm1636_vm4, %v1633_v1 }
 0xe26   : > { %v1631_v2 = vpop.permute.xlu0 %1630 }
 0xe2b   : > { %v1303_v3 = vpop.permute.xlu1 %1302 }
 0xe2c   : > { %1309 = vst.msk [vmem:[#allocation2] sm:$0xf] %vm1308_vm3, %v1303_v3 }
 0xe2d   : > { %1637 = vst.msk [vmem:[#allocation2] sm:$0xf] %vm1636_vm4, %v1631_v2 }
 0xe2e   : > { %v1961_v5 = vpop.permute.xlu0 %1960 }
 0xe2f   : > { %1966 = vst.msk [vmem:[#allocation2 + $0x4] sm:$0xf] %vm1964_vm5, %v1961_v5 }
 0xe33   : > { %v1959_v7 = vpop.permute.xlu1 %1958 }
 0xe34   : > { %1965 = vst.msk [vmem:[#allocation2] sm:$0xf] %vm1964_vm5, %v1959_v7 }
 0xe35   : > { %2293 = vst.msk [vmem:[#allocation2] sm:$0xf] %vm2292_vm6, %v2287_v6 }
 0xe36   : > { %v2615_v8 = vpop.permute.xlu0 %2614 }
 0xe37   : > { %2621 = vst.msk [vmem:[#allocation2] sm:$0xf] %vm2620_vm7, %v2615_v8 }
 0xe3b   : > { %v2289_v10 = vpop.permute.xlu1 %2288 }
 0xe3c   : > { %2294 = vst.msk [vmem:[#allocation2 + $0x4] sm:$0xf] %vm2292_vm6, %v2289_v10 }
 0xe3d   : > { %2622 = vst.msk [vmem:[#allocation2 + $0x4] sm:$0xf] %vm2620_vm7, %v2617_v11 }
 0xea2   : > { %v2933_v19 = vpop.f32.mrf.mxu2 }
 0xea3   : > { %v2938_v20 = vpack.c.bf16 %v2933_v19, %v2933_v19 }
 0xea5   : > { %2942 = vrot.lane.b32.xlu1 %v2938_v20, %s4726_s21 }
 0xeaa   : > { %v2935_v21 = vpop.f32.mrf.mxu2 }
 0xeab   : > { %v2939_v22 = vpack.c.bf16 %v2935_v21, %v2935_v21 }
 0xead   : > { %2944 = vrot.lane.b32.xlu0 %v2939_v22, %s4726_s21 }
 0xf17   : > { %v2943_v26 = vpop.permute.xlu1 %2942 }
 0xf18   : > { %2949 = vst.msk [vmem:[#allocation2] sm:$0xf] %vm2948_vm8, %v2943_v26 }
 0xf1f   : > { %v2945_v42 = vpop.permute.xlu0 %2944 }
 0xf20   : > { %2950 = vst.msk [vmem:[#allocation2 + $0x4] sm:$0xf] %vm2948_vm8, %v2945_v42 }
 0xf27   : > { %v4508_v27 = vld [vmem:[#allocation2] sm:$0xff] }
 0xf28   : > { %3035 = vmatmul.bf16.vlgmr.msra.gmra.mxu3 %v4508_v27 }
 0xfab   : > { %v3036_v53 = vpop.f32.mrf.mxu3 }
 0xfac   : > { %v3037_v29 = vadd.f32 %v4590_v28, %v3036_v53 }
 0xfae   : > { %3041 = vst [vmem:[%s325_s26] sm:$0xff] %v3037_v29 }
 0xfb3   : > { %v3038_v30 = vpop.f32.mrf.mxu3 }
 0xfb4   : > { %v3039_v60 = vadd.f32 %v4590_v28, %v3038_v30 }
 0xfb6   : > { %3042 = vst [vmem:[%s325_s26 + $0x8] sm:$0xff] %v3039_v60 }
 0xfb7   : > { %4683 = shalt.err (!%p4680_p3)
}
 0xfb8   : > { %s4727_s16 = smov 128   ;;  %s4728_s25 = smov 8  }
 0xfb9   : > { %4518 = dma.vmem_to_hbm [thread:$0]  (%p4817_p5), %s3057_s27, 256, %s3059_s28, %s3044_s29, %s4727_s16, %s4727_s16, %s4728_s25  }
 0xfba PF: > { %p4524_p4 = scmp.ge.s32.totalorder %s4718_s12, 2  ;;  %s3073_s26 = sand.u32 1, %s4706_s30  }
 0xfbb   : > { %s3074_s21 = scalar_lea.sflag [#allocation4], %s3073_s26 }
 0xfbc   : > { %p4521_p7 = pnand %p4524_p4, %p4821_p6 }
 0xfbe   : > { %p4522_p8 = pneg %p4521_p7 }
 0xfc0   : > { %4701 = dma.done.wait (%p4522_p8), %s3074_s21, 256  }
 0xfc1   : > { %4703 = vsyncadd (%p4522_p8), %s3074_s21, 4294967040  ;;  %p19_p9 = scmp.ge.s32.totalorder %s4804_s15, 4   ;;  %s5695_s30 = smov %s4710_s10 }
 0xfc2   : > { %s5696_s10 = smov %s4714_s11  ;;  %s5697_s11 = smov %s4815_s18 }
 0xfc3   : > { %s5698_s12 = smov %s4804_s15  ;;  %21 = sbr.rel (!%p19_p9) target bundleno = 3 (0x3), region = 133 }
 0xfc8   :  { %3080 = vsyncpa [#allocation4], 1 }
 0xfc9   :  { %3082 = vsyncpa [#allocation4 + $0x1], 1 }

</bundles_post_ra>
